<compile_context>
chip_gen: v6e
topology: v6e:2x2x1
jax: 0.10.0
libtpu: 0.0.40
codegen_flags: <defaults>
</compile_context>

<pallas_src>
import jax
import jax.numpy as jnp
from jax.experimental import pallas as pl
from jax.experimental.pallas import tpu as pltpu


_VMEM_LIMIT = 48 * 1024 * 1024  # > scoped defaults, < v7x physical 64 MiB


def _round_up(x, m):
    return ((x + m - 1) // m) * m


def _cdiv(a, b):
    return (a + b - 1) // b


def _row_tile(rows, target=1024):
    """Pick a row tile (multiple of 8) and the padded row count."""
    tr = min(target, _round_up(rows, 8))
    n = _cdiv(rows, tr)
    return tr, n, n * tr


# --------------------------- conv3x3 + bias + ReLU ---------------------------

def conv3x3_relu(x_nhwc, w_hwio, b):
    """3x3 conv, stride 1, pad 1, fused bias + ReLU (VGG conv block).

    Shift-matmul formulation: on the flattened zero-padded grid every tap is a
    constant row offset, so no im2col copy is materialized in HBM.
    """
    N, H, W, Cin = x_nhwc.shape
    Cout = w_hwio.shape[-1]
    Hp, P = H + 2, W + 2

    # ---- host-side glue: spatial zero-pad once, flatten, bf16 cast ----
    xp = jnp.pad(x_nhwc.astype(jnp.bfloat16), ((0, 0), (1, 1), (1, 1), (0, 0)))
    cin_p = _round_up(Cin, 8)                       # pad K (first conv: 3 -> 8)
    if cin_p != Cin:
        xp = jnp.pad(xp, ((0, 0), (0, 0), (0, 0), (0, cin_p - Cin)))

    m_full = N * Hp * P                             # padded-grid positions
    tm = min(256, _round_up(m_full, 8))             # row tile (256-row target)
    n_m = _cdiv(m_full, tm)
    m_pad = n_m * tm
    halo = 2 * P + 2                                # max tap offset
    xr = _round_up(tm + halo, 8)                    # VMEM window rows
    r_x = m_pad + xr                                # HBM rows incl. halo pad

    xf = xp.reshape(m_full, cin_p)
    xf = jnp.pad(xf, ((0, r_x - m_full), (0, 0)))   # zero tail for halo reads

    wm = w_hwio
    if cin_p != Cin:
        wm = jnp.pad(wm, ((0, 0), (0, 0), (0, cin_p - Cin), (0, 0)))
    wm = wm.reshape(9, cin_p, Cout).astype(jnp.bfloat16)
    bias = b.reshape(1, Cout).astype(jnp.float32)

    tn = Cout if Cout < 128 else min(256, Cout)     # 64/128/256/256
    n_j = Cout // tn
    offs = [dy * P + dx for dy in range(3) for dx in range(3)]

    def kernel(xf_hbm, w_ref, b_ref, o_ref, xbuf, sem):
        m = pl.program_id(0)

        # Fetch the (tm + halo) activation window once per M tile (j == 0),
        # reuse it for every Cout tile.
        # TODO(synk): double-buffer this DMA (prefetch tile m+1) to overlap
        # the halo fetch with the matmuls.
        @pl.when(pl.program_id(1) == 0)
        def _():
            cp = pltpu.make_async_copy(
                xf_hbm.at[pl.ds(m * tm, xr)], xbuf, sem.at[0])
            cp.start()
            cp.wait()

        acc = jnp.dot(xbuf[pl.ds(offs[0], tm), :], w_ref[0],
                      preferred_element_type=jnp.float32)
        for t in range(1, 9):
            acc = acc + jnp.dot(xbuf[pl.ds(offs[t], tm), :], w_ref[t],
                                preferred_element_type=jnp.float32)
        acc = acc + b_ref[...]
        o_ref[...] = jnp.maximum(acc, 0.0).astype(o_ref.dtype)

    flops = 2 * m_pad * 9 * cin_p * Cout
    bytes_accessed = (r_x * cin_p * 2 + 9 * cin_p * Cout * 2
                      + Cout * 4 + m_pad * Cout * 2)

    out_flat = pl.pallas_call(
        kernel,
        out_shape=jax.ShapeDtypeStruct((m_pad, Cout), jnp.bfloat16),
        grid=(n_m, n_j),
        in_specs=[
            pl.BlockSpec(memory_space=pl.ANY),                     # x (HBM)
            pl.BlockSpec((9, cin_p, tn), lambda m, j: (0, 0, j)),  # weights
            pl.BlockSpec((1, tn), lambda m, j: (0, j)),            # bias
        ],
        out_specs=pl.BlockSpec((tm, tn), lambda m, j: (m, j)),
        scratch_shapes=[
            pltpu.VMEM((xr, cin_p), jnp.bfloat16),
            pltpu.SemaphoreType.DMA((1,)),
        ],
        compiler_params=pltpu.CompilerParams(
            dimension_semantics=("parallel", "arbitrary"),
            vmem_limit_bytes=_VMEM_LIMIT),
        cost_estimate=pl.CostEstimate(flops=flops, transcendentals=0,
                                      bytes_accessed=bytes_accessed),
    )(xf, wm, bias)

    # drop junk (padded-grid) rows/cols, back to valid NHWC
    y = out_flat[:m_full].reshape(N, Hp, P, Cout)[:, :H, :W, :]
    return y


# -------------------------------- max pool ----------------------------------

def _max4_kernel(a_ref, b_ref, c_ref, d_ref, o_ref):
    o_ref[...] = jnp.maximum(jnp.maximum(a_ref[...], b_ref[...]),
                             jnp.maximum(c_ref[...], d_ref[...]))


def maxpool2x2(x_nhwc):
    """nn.MaxPool2d(kernel_size=2, stride=2), tiled over rows."""
    # TODO(synk): fuse the 2x2 pool into the preceding conv epilogue to save
    # one activation round trip to HBM.
    N, H, W, C = x_nhwc.shape
    Ho, Wo = H // 2, W // 2
    rows = N * Ho * Wo
    tr, n_r, rows_pad = _row_tile(rows)

    views = []
    for dy in range(2):
        for dx in range(2):
            v = x_nhwc[:, dy::2, dx::2, :].reshape(rows, C)
            views.append(jnp.pad(v, ((0, rows_pad - rows), (0, 0))))

    out = pl.pallas_call(
        _max4_kernel,
        out_shape=jax.ShapeDtypeStruct((rows_pad, C), x_nhwc.dtype),
        grid=(n_r,),
        in_specs=[pl.BlockSpec((tr, C), lambda i: (i, 0)) for _ in range(4)],
        out_specs=pl.BlockSpec((tr, C), lambda i: (i, 0)),
        compiler_params=pltpu.CompilerParams(
            dimension_semantics=("parallel",),
            vmem_limit_bytes=_VMEM_LIMIT),
    )(*views)
    return out[:rows].reshape(N, Ho, Wo, C)


# ------------------------- normalize + LPIPS weight -------------------------

def _normalize_lin_kernel(x_ref, w_ref, o_ref):
    # B.normalize_tensor: x / (sqrt(sum_c x^2) + eps), then * sqrt(lpips w).
    x = x_ref[...].astype(jnp.float32)              # keep eps math in f32
    ssq = jnp.sum(x * x, axis=-1, keepdims=True)
    inv = pl.reciprocal(jnp.sqrt(ssq) + 1e-10, approx=True)
    o_ref[...] = x * inv * w_ref[...]


def normalize_and_lin(feat_nhwc, lin_w):
    N, H, W, C = feat_nhwc.shape
    rows = N * H * W
    tr, n_r, rows_pad = _row_tile(rows)
    x = jnp.pad(feat_nhwc.reshape(rows, C), ((0, rows_pad - rows), (0, 0)))

    out = pl.pallas_call(
        _normalize_lin_kernel,
        out_shape=jax.ShapeDtypeStruct((rows_pad, C), jnp.float32),
        grid=(n_r,),
        in_specs=[pl.BlockSpec((tr, C), lambda i: (i, 0)),
                  pl.BlockSpec((1, C), lambda i: (0, 0))],
        out_specs=pl.BlockSpec((tr, C), lambda i: (i, 0)),
        compiler_params=pltpu.CompilerParams(
            dimension_semantics=("parallel",),
            vmem_limit_bytes=_VMEM_LIMIT),
    )(x, lin_w.reshape(1, C).astype(jnp.float32))
    return out[:rows].reshape(N, H, W, C)


# ------------------------------ LPNet forward --------------------------------

# (apply 2x2 maxpool before the convs of this slice?, number of 3x3 convs)
_SLICES = [(False, 2), (True, 2), (True, 3), (True, 3), (True, 3)]
_CONV_SHAPES = [(3, 64), (64, 64),
                (64, 128), (128, 128),
                (128, 256), (256, 256), (256, 256),
                (256, 512), (512, 512), (512, 512),
                (512, 512), (512, 512), (512, 512)]
_LIN_CHANS = [64, 128, 256, 512, 512]


def init_params(key):
    # TODO(synk): torchvision pretrained VGG16 + LPIPS .pth weight loading has
    # no in-script equivalent; deterministic random weights of the same shapes.
    convs = []
    for (cin, cout) in _CONV_SHAPES:
        key, k1, k2 = jax.random.split(key, 3)
        w = jax.random.normal(k1, (3, 3, cin, cout), jnp.float32) / jnp.sqrt(9.0 * cin)
        b = jax.random.normal(k2, (cout,), jnp.float32) * 0.01
        convs.append((w, b))
    lins = []
    for c in _LIN_CHANS:
        key, k = jax.random.split(key)
        raw = jax.random.uniform(k, (c,), jnp.float32)   # non-negative LPIPS weights
        lins.append(jnp.sqrt(raw))                       # module stores sqrt(weight)
    return {"convs": convs, "lins": lins}


def lpnet_forward(in0_nchw, params, avg=False):
    # in0 = 2 * in0 - 1, then ScalingLayer: (x - shift) / scale
    shift = jnp.array([-0.030, -0.088, -0.188], jnp.float32).reshape(1, 3, 1, 1)
    scale = jnp.array([0.458, 0.448, 0.450], jnp.float32).reshape(1, 3, 1, 1)
    x = (2.0 * in0_nchw - 1.0 - shift) / scale
    x = jnp.transpose(x, (0, 2, 3, 1))  # NCHW -> NHWC for the trunk

    feats = []
    ci = 0
    for do_pool, n_convs in _SLICES:
        if do_pool:
            x = maxpool2x2(x)
        for _ in range(n_convs):
            w, b = params["convs"][ci]
            x = conv3x3_relu(x, w, b)
            ci += 1
        feats.append(x)  # relu1_2, relu2_2, relu3_3, relu4_3, relu5_3

    res, shapes = [], []
    for kk in range(5):
        f = normalize_and_lin(feats[kk], params["lins"][kk])  # NHWC, f32
        f_nchw = jnp.transpose(f, (0, 3, 1, 2))               # back to NCHW
        if avg:
            res.append(jnp.mean(f_nchw, axis=(2, 3)))
        else:
            shapes.append(f_nchw.shape[-1])
            res.append(f_nchw.reshape(f_nchw.shape[0], -1))
    return res, shapes


# ----------------------------------- main ------------------------------------

if __name__ == "__main__":
    key = jax.random.PRNGKey(0)
    kx, kp = jax.random.split(key)
    in0 = jax.random.uniform(kx, (2, 3, 16, 16), jnp.float32)  # NCHW, like PyTorch
    params = init_params(kp)

    res, shapes = lpnet_forward(in0, params, avg=False)
    res = jax.block_until_ready(res)

    expected_c = [64, 128, 256, 512, 512]
    expected_s = [16, 8, 4, 2, 1]
    assert shapes == expected_s, (shapes, expected_s)
    for r, c, s in zip(res, expected_c, expected_s):
        assert r.shape == (2, c * s * s), r.shape
        assert bool(jnp.all(jnp.isfinite(r)))
    print("KERNEL_OK")
</pallas_src>

<mosaic_0001>
module attributes {stable_mosaic.version = 11 : i64} {
  func.func @kernel(%arg0: i32, %arg1: i32, %arg2: memref<1064x8xbf16, #tpu.memory_space<any>>, %arg3: memref<9x8x64xbf16, #tpu.memory_space<vmem>>, %arg4: memref<1x64xf32, #tpu.memory_space<vmem>>, %arg5: memref<256x64xbf16, #tpu.memory_space<vmem>>, %arg6: memref<296x8xbf16, #tpu.memory_space<vmem>>, %arg7: memref<1x!tpu.dma_semaphore, #tpu.memory_space<semaphore_mem>>) attributes {dimension_semantics = [#tpu.dimension_semantics<parallel>, #tpu.dimension_semantics<arbitrary>], iteration_bounds = array<i64: 3, 1>, scalar_prefetch = 0 : i64, scratch_operands = 2 : i64, tpu.core_type = #tpu.core_type<tc>, window_params = [{}, {transform_indices = @transform_1, window_bounds = array<i64: 9, 8, 64>}, {transform_indices = @transform_2, window_bounds = array<i64: 1, 64>}, {transform_indices = @transform_3, window_bounds = array<i64: 256, 64>}]} {
    %c0_i32 = arith.constant 0 : i32
    %0 = arith.cmpi eq, %arg1, %c0_i32 : i32
    %1 = arith.extui %0 : i1 to i32
    %c0_i32_0 = arith.constant 0 : i32
    %2 = arith.cmpi ne, %1, %c0_i32_0 : i32
    scf.if %2 {
      %c256_i32 = arith.constant 256 : i32
      %54 = arith.muli %arg0, %c256_i32 : i32
      %c0_i32_44 = arith.constant 0 : i32
      %c0_i32_45 = arith.constant 0 : i32
      %55 = tpu.memref_slice %arg2[%54, %c0_i32_45] : memref<1064x8xbf16, #tpu.memory_space<any>> -> memref<296x8xbf16, #tpu.memory_space<any>>
      %56 = tpu.memref_slice %arg7[%c0_i32_44] : memref<1x!tpu.dma_semaphore, #tpu.memory_space<semaphore_mem>> -> memref<1x!tpu.dma_semaphore, #tpu.memory_space<semaphore_mem>>
      %57 = tpu.memref_squeeze %56 : memref<1x!tpu.dma_semaphore, #tpu.memory_space<semaphore_mem>> -> memref<!tpu.dma_semaphore, #tpu.memory_space<semaphore_mem>>
      tpu.enqueue_dma source(%55 : memref<296x8xbf16, #tpu.memory_space<any>>) target(%arg6 : memref<296x8xbf16, #tpu.memory_space<vmem>>) target_semaphore(%57 : memref<!tpu.dma_semaphore, #tpu.memory_space<semaphore_mem>>)
      %c0_i32_46 = arith.constant 0 : i32
      %c0_i32_47 = arith.constant 0 : i32
      %58 = tpu.memref_slice %arg2[%54, %c0_i32_47] : memref<1064x8xbf16, #tpu.memory_space<any>> -> memref<296x8xbf16, #tpu.memory_space<any>>
      %59 = tpu.memref_slice %arg7[%c0_i32_46] : memref<1x!tpu.dma_semaphore, #tpu.memory_space<semaphore_mem>> -> memref<1x!tpu.dma_semaphore, #tpu.memory_space<semaphore_mem>>
      %60 = tpu.memref_squeeze %59 : memref<1x!tpu.dma_semaphore, #tpu.memory_space<semaphore_mem>> -> memref<!tpu.dma_semaphore, #tpu.memory_space<semaphore_mem>>
      tpu.wait_dma2 semaphore(%60 : memref<!tpu.dma_semaphore, #tpu.memory_space<semaphore_mem>>) src(%58 : memref<296x8xbf16, #tpu.memory_space<any>>) dst(%arg6 : memref<296x8xbf16, #tpu.memory_space<vmem>>)
    } else {
    }
    %c0 = arith.constant 0 : index
    %c0_1 = arith.constant 0 : index
    %3 = vector.load %arg6[%c0, %c0_1] : memref<296x8xbf16, #tpu.memory_space<vmem>>, vector<256x8xbf16>
    %c0_2 = arith.constant 0 : index
    %c0_3 = arith.constant 0 : index
    %c0_4 = arith.constant 0 : index
    %4 = vector.load %arg3[%c0_2, %c0_3, %c0_4] : memref<9x8x64xbf16, #tpu.memory_space<vmem>>, vector<1x8x64xbf16>
    %5 = vector.shape_cast %4 : vector<1x8x64xbf16> to vector<8x64xbf16>
    %cst = arith.constant dense<0.000000e+00> : vector<256x64xf32>
    %6 = tpu.matmul %3, %5, %cst {dimension_numbers = #tpu.dot_dimension_numbers<[1], [0], [0], [1], [0, 0, 1, 1], [], []>} : vector<256x8xbf16>, vector<8x64xbf16>, vector<256x64xf32> -> vector<256x64xf32>
    %c1 = arith.constant 1 : index
    %c0_5 = arith.constant 0 : index
    %7 = vector.load %arg6[%c1, %c0_5] : memref<296x8xbf16, #tpu.memory_space<vmem>>, vector<256x8xbf16>
    %c1_6 = arith.constant 1 : index
    %c0_7 = arith.constant 0 : index
    %c0_8 = arith.constant 0 : index
    %8 = vector.load %arg3[%c1_6, %c0_7, %c0_8] : memref<9x8x64xbf16, #tpu.memory_space<vmem>>, vector<1x8x64xbf16>
    %9 = vector.shape_cast %8 : vector<1x8x64xbf16> to vector<8x64xbf16>
    %cst_9 = arith.constant dense<0.000000e+00> : vector<256x64xf32>
    %10 = tpu.matmul %7, %9, %cst_9 {dimension_numbers = #tpu.dot_dimension_numbers<[1], [0], [0], [1], [0, 0, 1, 1], [], []>} : vector<256x8xbf16>, vector<8x64xbf16>, vector<256x64xf32> -> vector<256x64xf32>
    %11 = arith.addf %6, %10 : vector<256x64xf32>
    %c2 = arith.constant 2 : index
    %c0_10 = arith.constant 0 : index
    %12 = vector.load %arg6[%c2, %c0_10] : memref<296x8xbf16, #tpu.memory_space<vmem>>, vector<256x8xbf16>
    %c2_11 = arith.constant 2 : index
    %c0_12 = arith.constant 0 : index
    %c0_13 = arith.constant 0 : index
    %13 = vector.load %arg3[%c2_11, %c0_12, %c0_13] : memref<9x8x64xbf16, #tpu.memory_space<vmem>>, vector<1x8x64xbf16>
    %14 = vector.shape_cast %13 : vector<1x8x64xbf16> to vector<8x64xbf16>
    %cst_14 = arith.constant dense<0.000000e+00> : vector<256x64xf32>
    %15 = tpu.matmul %12, %14, %cst_14 {dimension_numbers = #tpu.dot_dimension_numbers<[1], [0], [0], [1], [0, 0, 1, 1], [], []>} : vector<256x8xbf16>, vector<8x64xbf16>, vector<256x64xf32> -> vector<256x64xf32>
    %16 = arith.addf %11, %15 : vector<256x64xf32>
    %c18 = arith.constant 18 : index
    %c0_15 = arith.constant 0 : index
    %17 = vector.load %arg6[%c18, %c0_15] : memref<296x8xbf16, #tpu.memory_space<vmem>>, vector<256x8xbf16>
    %c3 = arith.constant 3 : index
    %c0_16 = arith.constant 0 : index
    %c0_17 = arith.constant 0 : index
    %18 = vector.load %arg3[%c3, %c0_16, %c0_17] : memref<9x8x64xbf16, #tpu.memory_space<vmem>>, vector<1x8x64xbf16>
    %19 = vector.shape_cast %18 : vector<1x8x64xbf16> to vector<8x64xbf16>
    %cst_18 = arith.constant dense<0.000000e+00> : vector<256x64xf32>
    %20 = tpu.matmul %17, %19, %cst_18 {dimension_numbers = #tpu.dot_dimension_numbers<[1], [0], [0], [1], [0, 0, 1, 1], [], []>} : vector<256x8xbf16>, vector<8x64xbf16>, vector<256x64xf32> -> vector<256x64xf32>
    %21 = arith.addf %16, %20 : vector<256x64xf32>
    %c19 = arith.constant 19 : index
    %c0_19 = arith.constant 0 : index
    %22 = vector.load %arg6[%c19, %c0_19] : memref<296x8xbf16, #tpu.memory_space<vmem>>, vector<256x8xbf16>
    %c4 = arith.constant 4 : index
    %c0_20 = arith.constant 0 : index
    %c0_21 = arith.constant 0 : index
    %23 = vector.load %arg3[%c4, %c0_20, %c0_21] : memref<9x8x64xbf16, #tpu.memory_space<vmem>>, vector<1x8x64xbf16>
    %24 = vector.shape_cast %23 : vector<1x8x64xbf16> to vector<8x64xbf16>
    %cst_22 = arith.constant dense<0.000000e+00> : vector<256x64xf32>
    %25 = tpu.matmul %22, %24, %cst_22 {dimension_numbers = #tpu.dot_dimension_numbers<[1], [0], [0], [1], [0, 0, 1, 1], [], []>} : vector<256x8xbf16>, vector<8x64xbf16>, vector<256x64xf32> -> vector<256x64xf32>
    %26 = arith.addf %21, %25 : vector<256x64xf32>
    %c20 = arith.constant 20 : index
    %c0_23 = arith.constant 0 : index
    %27 = vector.load %arg6[%c20, %c0_23] : memref<296x8xbf16, #tpu.memory_space<vmem>>, vector<256x8xbf16>
    %c5 = arith.constant 5 : index
    %c0_24 = arith.constant 0 : index
    %c0_25 = arith.constant 0 : index
    %28 = vector.load %arg3[%c5, %c0_24, %c0_25] : memref<9x8x64xbf16, #tpu.memory_space<vmem>>, vector<1x8x64xbf16>
    %29 = vector.shape_cast %28 : vector<1x8x64xbf16> to vector<8x64xbf16>
    %cst_26 = arith.constant dense<0.000000e+00> : vector<256x64xf32>
    %30 = tpu.matmul %27, %29, %cst_26 {dimension_numbers = #tpu.dot_dimension_numbers<[1], [0], [0], [1], [0, 0, 1, 1], [], []>} : vector<256x8xbf16>, vector<8x64xbf16>, vector<256x64xf32> -> vector<256x64xf32>
    %31 = arith.addf %26, %30 : vector<256x64xf32>
    %c36 = arith.constant 36 : index
    %c0_27 = arith.constant 0 : index
    %32 = vector.load %arg6[%c36, %c0_27] : memref<296x8xbf16, #tpu.memory_space<vmem>>, vector<256x8xbf16>
    %c6 = arith.constant 6 : index
    %c0_28 = arith.constant 0 : index
    %c0_29 = arith.constant 0 : index
    %33 = vector.load %arg3[%c6, %c0_28, %c0_29] : memref<9x8x64xbf16, #tpu.memory_space<vmem>>, vector<1x8x64xbf16>
    %34 = vector.shape_cast %33 : vector<1x8x64xbf16> to vector<8x64xbf16>
    %cst_30 = arith.constant dense<0.000000e+00> : vector<256x64xf32>
    %35 = tpu.matmul %32, %34, %cst_30 {dimension_numbers = #tpu.dot_dimension_numbers<[1], [0], [0], [1], [0, 0, 1, 1], [], []>} : vector<256x8xbf16>, vector<8x64xbf16>, vector<256x64xf32> -> vector<256x64xf32>
    %36 = arith.addf %31, %35 : vector<256x64xf32>
    %c37 = arith.constant 37 : index
    %c0_31 = arith.constant 0 : index
    %37 = vector.load %arg6[%c37, %c0_31] : memref<296x8xbf16, #tpu.memory_space<vmem>>, vector<256x8xbf16>
    %c7 = arith.constant 7 : index
    %c0_32 = arith.constant 0 : index
    %c0_33 = arith.constant 0 : index
    %38 = vector.load %arg3[%c7, %c0_32, %c0_33] : memref<9x8x64xbf16, #tpu.memory_space<vmem>>, vector<1x8x64xbf16>
    %39 = vector.shape_cast %38 : vector<1x8x64xbf16> to vector<8x64xbf16>
    %cst_34 = arith.constant dense<0.000000e+00> : vector<256x64xf32>
    %40 = tpu.matmul %37, %39, %cst_34 {dimension_numbers = #tpu.dot_dimension_numbers<[1], [0], [0], [1], [0, 0, 1, 1], [], []>} : vector<256x8xbf16>, vector<8x64xbf16>, vector<256x64xf32> -> vector<256x64xf32>
    %41 = arith.addf %36, %40 : vector<256x64xf32>
    %c38 = arith.constant 38 : index
    %c0_35 = arith.constant 0 : index
    %42 = vector.load %arg6[%c38, %c0_35] : memref<296x8xbf16, #tpu.memory_space<vmem>>, vector<256x8xbf16>
    %c8 = arith.constant 8 : index
    %c0_36 = arith.constant 0 : index
    %c0_37 = arith.constant 0 : index
    %43 = vector.load %arg3[%c8, %c0_36, %c0_37] : memref<9x8x64xbf16, #tpu.memory_space<vmem>>, vector<1x8x64xbf16>
    %44 = vector.shape_cast %43 : vector<1x8x64xbf16> to vector<8x64xbf16>
    %cst_38 = arith.constant dense<0.000000e+00> : vector<256x64xf32>
    %45 = tpu.matmul %42, %44, %cst_38 {dimension_numbers = #tpu.dot_dimension_numbers<[1], [0], [0], [1], [0, 0, 1, 1], [], []>} : vector<256x8xbf16>, vector<8x64xbf16>, vector<256x64xf32> -> vector<256x64xf32>
    %46 = arith.addf %41, %45 : vector<256x64xf32>
    %c0_39 = arith.constant 0 : index
    %c0_40 = arith.constant 0 : index
    %47 = vector.load %arg4[%c0_39, %c0_40] : memref<1x64xf32, #tpu.memory_space<vmem>>, vector<1x64xf32>
    %48 = vector.broadcast %47 : vector<1x64xf32> to vector<256x64xf32>
    %49 = arith.addf %46, %48 : vector<256x64xf32>
    %cst_41 = arith.constant 0.000000e+00 : f32
    %50 = vector.broadcast %cst_41 : f32 to vector<256x64xf32>
    %51 = arith.maximumf %49, %50 : vector<256x64xf32>
    %52 = arith.truncf %51 : vector<256x64xf32> to vector<256x64xbf16>
    %c0_42 = arith.constant 0 : index
    %c0_43 = arith.constant 0 : index
    %53 = vector.load %arg5[%c0_42, %c0_43] : memref<256x64xbf16, #tpu.memory_space<vmem>>, vector<256x64xbf16>
    tpu.vector_store %arg5[%c0_42, %c0_43], %52 {strides = array<i32>} : memref<256x64xbf16, #tpu.memory_space<vmem>>, vector<256x64xbf16>,
    return
  }
  func.func @transform_1(%arg0: i32, %arg1: i32) -> (i32, i32, i32) {
    %c0_i32 = arith.constant 0 : i32
    %c0_i32_0 = arith.constant 0 : i32
    %c0_i32_1 = arith.constant 0 : i32
    return %c0_i32, %c0_i32_0, %arg1 : i32, i32, i32
  }
  func.func @transform_2(%arg0: i32, %arg1: i32) -> (i32, i32) {
    %c0_i32 = arith.constant 0 : i32
    %c0_i32_0 = arith.constant 0 : i32
    return %c0_i32, %arg1 : i32, i32
  }
  func.func @transform_3(%arg0: i32, %arg1: i32) -> (i32, i32) {
    %c0_i32 = arith.constant 0 : i32
    return %arg0, %arg1 : i32, i32
  }
}

</mosaic_0001>

<bundles_post_ra>
// kernel: tpu_custom_call.1
= control target key start
LH: loop header
LB: loop body
LE: loop exit
PB: predicated region body
PF: predicated region fallthrough
CT: control target
= control target key end

     0   :  { %s4619_s12 = smov 0   ;;  %s4621_s13 = smov 0   ;;  %s5981_s0 = inlined_call_operand.vmem [shape: bf16[1064,8], index: 0, kind: input, shape index: {}]   ;;  %s5982_s1 = inlined_call_operand.vmem [shape: bf16[9,8,64], index: 1, kind: input, shape index: {}]   ;;  %s5983_s2 = inlined_call_operand.vmem [shape: f32[1,64], index: 2, kind: input, shape index: {}]   ;;  %s5984_s3 = inlined_call_operand.vmem [shape: bf16[768,64], index: 3, kind: output, shape index: {}]  }
   0x1   :  { %s4623_s14 = smov 0  }
   0x2 LB: > { %s25_s15 = sadd.s32 1, %s4593_s13  ;;  %p3740_p0 = scmp.ge.s32.totalorder %s4597_s14, 1  ;;  %s4597_s14 = sphi %s4623_s14, %s13_s14   ;;  %s4593_s13 = sphi %s4621_s13, %s6102_s13   ;;  %s4589_s12 = sphi %s4619_s12, %s6101_s12  }
   0x3   : > { %p27_p1 = scmp.ge.s32.totalorder %s25_s15, 3  ;;  %p134_p2 = scmp.lt.s32.totalorder %s4597_s14, 4 }
   0x5   : > { %s6104_s15 = smov (%p27_p1, %s25_s15), 0  ;;  %p135_p3 = pnand %p3740_p0, %p134_p2 }
   0x7   : > { %138 = sbr.rel (%p135_p3) target bundleno = 531 (0x213), region = 28 }
   0xc   : > { %s3741_s16 = sshll.u32 %s4589_s12, 5  ;;  %s3743_s17 = sshll.u32 %s4589_s12, 8 }
   0xd   : > { %p169_p4 = scmp.lt.s32.totalorder %s3741_s16, 95  ;;  %s183_s18 = sshra.s32 %s3743_s17, 3 }
   0xe   : > { %s3744_s19 = sshll.u32 %s183_s18, 2 }
   0xf   : > { %s6106_s16 = smov (!%p169_p4, %s3741_s16), 95  ;;  %s4640_s22 = scalar_lea.vmem %s5981_s0, %s3744_s19 }
  0x10   : > { %s3742_s23 = sshll.u32 %s6106_s16, 2  ;;  %v225_v0 = vld [vmem:[%s4640_s22] sm:$0xff]  ;;  %v227_v1 = vld [vmem:[%s4640_s22 + $0x8] sm:$0xff]  ;;  %v229_v2 = vld [vmem:[%s4640_s22 + $0x10] sm:$0xff] }
  0x11   : > { %s4648_s26 = scalar_lea.vmem %s5984_s3, %s3742_s23  ;;  %226 = vst [vmem:[#allocation2] sm:$0xff] %v225_v0  ;;  %228 = vst [vmem:[#allocation2 + $0x8] sm:$0xff] %v227_v1  ;;  %v231_v3 = vld [vmem:[%s4640_s22 + $0x18] sm:$0xff]  ;;  %v233_v4 = vld [vmem:[%s4640_s22 + $0x20] sm:$0xff] }
  0x12   : > { %230 = vst [vmem:[#allocation2 + $0x10] sm:$0xff] %v229_v2  ;;  %v235_v5 = vld [vmem:[%s4640_s22 + $0x28] sm:$0xff]  ;;  %232 = vst [vmem:[#allocation2 + $0x18] sm:$0xff] %v231_v3  ;;  %v237_v6 = vld [vmem:[%s4640_s22 + $0x30] sm:$0xff] }
  0x13   : > { %234 = vst [vmem:[#allocation2 + $0x20] sm:$0xff] %v233_v4  ;;  %236 = vst [vmem:[#allocation2 + $0x28] sm:$0xff] %v235_v5  ;;  %v239_v7 = vld [vmem:[%s4640_s22 + $0x38] sm:$0xff]  ;;  %v241_v8 = vld [vmem:[%s4640_s22 + $0x40] sm:$0xff] }
  0x14   : > { %238 = vst [vmem:[#allocation2 + $0x30] sm:$0xff] %v237_v6  ;;  %240 = vst [vmem:[#allocation2 + $0x38] sm:$0xff] %v239_v7  ;;  %v243_v9 = vld [vmem:[%s4640_s22 + $0x48] sm:$0xff]  ;;  %v245_v10 = vld [vmem:[%s4640_s22 + $0x50] sm:$0xff] }
  0x15   : > { %242 = vst [vmem:[#allocation2 + $0x40] sm:$0xff] %v241_v8  ;;  %v247_v11 = vld [vmem:[%s4640_s22 + $0x58] sm:$0xff]  ;;  %244 = vst [vmem:[#allocation2 + $0x48] sm:$0xff] %v243_v9  ;;  %v249_v12 = vld [vmem:[%s4640_s22 + $0x60] sm:$0xff] }
  0x16   : > { %246 = vst [vmem:[#allocation2 + $0x50] sm:$0xff] %v245_v10  ;;  %248 = vst [vmem:[#allocation2 + $0x58] sm:$0xff] %v247_v11  ;;  %v251_v13 = vld [vmem:[%s4640_s22 + $0x68] sm:$0xff]  ;;  %v253_v14 = vld [vmem:[%s4640_s22 + $0x70] sm:$0xff] }
  0x17   : > { %250 = vst [vmem:[#allocation2 + $0x60] sm:$0xff] %v249_v12  ;;  %252 = vst [vmem:[#allocation2 + $0x68] sm:$0xff] %v251_v13  ;;  %v255_v15 = vld [vmem:[%s4640_s22 + $0x78] sm:$0xff]  ;;  %v257_v16 = vld [vmem:[%s4640_s22 + $0x80] sm:$0xff] }
  0x18   : > { %254 = vst [vmem:[#allocation2 + $0x70] sm:$0xff] %v253_v14  ;;  %v259_v17 = vld [vmem:[%s4640_s22 + $0x88] sm:$0xff]  ;;  %256 = vst [vmem:[#allocation2 + $0x78] sm:$0xff] %v255_v15  ;;  %v3745_v18 = vld [vmem:[%s4640_s22 + $0x90] sm:$0xf] }
  0x19   : > { %258 = vst [vmem:[#allocation2 + $0x80] sm:$0xff] %v257_v16  ;;  %260 = vst [vmem:[#allocation2 + $0x88] sm:$0xff] %v259_v17 }
  0x1a   : > { %272 = vst [vmem:[#allocation2 + $0x90] sm:$0xf] %v3745_v18 }
  0x1b   : > { %276 = vsyncadd [#allocation3], 2368 }
  0x1c   : > { %4585 = dma.done.wait [#allocation3], 2368 }
  0x1d   : > { %4586 = vsyncadd [#allocation3], 4294964928  ;;  %vm582_vm0 = vcmask 1043456   ;;  %vm400_vm1 = vsmask.f32 7424  ;;  %v4677_v24 = vld [vmem:[#allocation2 + $0x8] sm:$0xff]  }
  0x1e   : > { %v3746_v19 = vld [vmem:[%s5982_s1 + $0x4] sm:$0xf]  ;;  %v281_v20 = vld [vmem:[#allocation2] sm:$0xf]  ;;  %v409_v27 = vshll.u32 %v4677_v24, 16  ;;  %v413_v28 = vshrl.u32 %v4677_v24, 16 }
  0x1f   : > { %v4669_v21 = vld [vmem:[#allocation2 + $0x4] sm:$0xf]  ;;  %4484 = vmatprep.subr.msk.bf16.mxu1 %vm582_vm0, %v3746_v19  ;;  %4483 = vmatprep.subr.msk.bf16.mxu0 %vm582_vm0, %v3746_v19  ;;  %v584_v22 = vsel %vm582_vm0, %v3746_v19, 0  ;;  %vm533_vm2 = vcmask 64512   ;;  %v4685_v30 = vld [vmem:[#allocation2 + $0x48] sm:$0xff]   ;;  %v4695_v38 = vld [vmem:[#allocation2 + $0x10] sm:$0xff]  }
  0x20   : > { %v4675_v23 = vcombine.low %v281_v20, %v4669_v21  ;;  %4482 = vmatpush3.bf16.msra.mxu1 %v584_v22  ;;  %4176 = vmatpush3.bf16.msra.mxu0 %v584_v22  ;;  %v4683_v29 = vld [vmem:[#allocation2 + $0x40] sm:$0xff]   ;;  %v411_v33 = vrot.slane %v409_v27, 1  ;;  %v473_v36 = vshll.u32 %v4685_v30, 16  ;;  %v477_v37 = vshrl.u32 %v4685_v30, 16  ;;  %v4697_v39 = vld [vmem:[#allocation2 + $0x50] sm:$0xff]   ;;  %v4700_v43 = vld [vmem:[#allocation2 + $0x18] sm:$0xff]  }
  0x21   : > { %v313_v31 = vld [vmem:[%s5982_s1] sm:$0xf]  ;;  %v465_v34 = vshll.u32 %v4683_v29, 16  ;;  %v469_v35 = vshrl.u32 %v4683_v29, 16  ;;  %v417_v46 = vshll.u32 %v4695_v38, 16  ;;  %v481_v47 = vshll.u32 %v4697_v39, 16 }
  0x22   : > { %v402_v25 = vshrl.u32 %v4675_v23, 16  ;;  %v404_v26 = vshll.u32 %v4675_v23, 16  ;;  %4485 = vmatprep.subr.msk.bf16.mxu1 %vm582_vm0, %v313_v31  ;;  %v415_v41 = vor.u32 %v413_v28, %v411_v33  ;;  %v780_v42 = vsel %vm582_vm0, %v313_v31, 0  ;;  %v3796_v48 = vld [vmem:[%s5982_s1 + $0x8] sm:$0xf]  ;;  %v4716_v57 = vld [vmem:[#allocation2 + $0x58] sm:$0xff]  }
  0x23   : > { %v4702_v44 = vrot.slane %v465_v34, 1  ;;  %v475_v45 = vrot.slane %v473_v36, 1  ;;  %4486 = vmatprep.subr.msk.bf16.mxu0 %vm582_vm0, %v3796_v48  ;;  %v1032_v50 = vsel %vm582_vm0, %v3796_v48, 0  ;;  %v421_v51 = vshrl.u32 %v4695_v38, 16  ;;  %v4719_v59 = vld [vmem:[#allocation2 + $0x20] sm:$0xff]   ;;  %v4733_v7 = vld [vmem:[#allocation2 + $0x28] sm:$0xff]  }
  0x24   : > { %v406_v32 = vrot.slane %v404_v26, 1  ;;  %v419_v54 = vrot.slane %v417_v46, 1  ;;  %v483_v55 = vrot.slane %v481_v47, 1  ;;  %v425_v56 = vshll.u32 %v4700_v43, 16  ;;  %v4728_v4 = vld [vmem:[#allocation2 + $0x60] sm:$0xff]   ;;  %v4740_v15 = vld [vmem:[#allocation2 + $0x68] sm:$0xff]  }
  0x25   : > { %v471_v52 = vor.u32 %v469_v35, %v4702_v44  ;;  %v479_v53 = vor.u32 %v477_v37, %v475_v45  ;;  %v485_v58 = vshrl.u32 %v4697_v39, 16  ;;  %v489_v2 = vshll.u32 %v4716_v57, 16  ;;  %v4744_v20 = vld [vmem:[#allocation2 + $0x30] sm:$0xff]  }
  0x26   : > { %v407_v40 = vor.u32 %v406_v32, %v402_v25  ;;  %v420_v61 = vsel %vm400_vm1, %v415_v41, %v419_v54  ;;  %v423_v63 = vor.u32 %v421_v51, %v419_v54  ;;  %v427_v0 = vrot.slane %v425_v56, 1  ;;  %v4747_v25 = vld [vmem:[#allocation2 + $0x70] sm:$0xff]   ;;  %v4757_v41 = vld [vmem:[#allocation2 + $0x38] sm:$0xff]   ;;  %v943_v56 = vld [vmem:[#allocation2] sm:$0xe] }
  0x27   : > { %v476_v60 = vsel %vm400_vm1, %v471_v52, %v475_v45  ;;  %v484_v62 = vsel %vm400_vm1, %v479_v53, %v483_v55  ;;  %v487_v1 = vor.u32 %v485_v58, %v483_v55  ;;  %v429_v3 = vshrl.u32 %v4700_v43, 16  ;;  %v4770_v55 = vld [vmem:[#allocation2 + $0x80] ss:$0 sps:$4 sm:$0x11]  }
  0x28   : > { %v412_v49 = vsel %vm400_vm1, %v407_v40, %v411_v33  ;;  %4193 = vmatprep.mubr.msk.bf16.mxu1 %vm533_vm2, %v476_v60  ;;  %v433_v5 = vshll.u32 %v4719_v59, 16  ;;  %v493_v6 = vshrl.u32 %v4716_v57, 16  ;;  %v437_v8 = vshrl.u32 %v4719_v59, 16 }
  0x29   : > { %4177 = vmatprep.mubr.msk.bf16.mxu0 %vm533_vm2, %v412_v49  ;;  %4194 = vmatmul.mubr.msk.bf16.vlgmr.msra.gmra.mxu1 %vm533_vm2, %v484_v62  ;;  %v428_v9 = vsel %vm400_vm1, %v423_v63, %v427_v0  ;;  %v491_v10 = vrot.slane %v489_v2, 1  ;;  %v431_v11 = vor.u32 %v429_v3, %v427_v0  ;;  %v497_v12 = vshll.u32 %v4728_v4, 16  ;;  %v3848_v62 = vld [vmem:[%s5982_s1 + $0x10] sm:$0xf] }
  0x2a   : > { %4178 = vmatmul.mubr.msk.bf16.vlgmr.msra.gmra.mxu0 %vm533_vm2, %v420_v61  ;;  %4210 = vmatpush3.bf16.msra.mxu1 %v780_v42  ;;  %v435_v13 = vrot.slane %v433_v5, 1  ;;  %v441_v14 = vshll.u32 %v4733_v7, 16  ;;  %v501_v16 = vshrl.u32 %v4728_v4, 16  ;;  %v445_v22 = vshrl.u32 %v4733_v7, 16  ;;  %v4759_v42 = vld [vmem:[#allocation2 + $0x78] sm:$0xff]  }
  0x2b   : > { %4244 = vmatpush3.bf16.msra.mxu0 %v1032_v50  ;;  %4181 = vmatprep.mubr.msk.bf16.mxu0 %vm533_vm2, %v428_v9  ;;  %v492_v17 = vsel %vm400_vm1, %v487_v1, %v491_v10  ;;  %v495_v18 = vor.u32 %v493_v6, %v491_v10  ;;  %v499_v19 = vrot.slane %v497_v12, 1  ;;  %v505_v31 = vshll.u32 %v4740_v15, 16  ;;  %v3814_v61 = vld [vmem:[%s5982_s1 + $0xc] sm:$0xf] }
  0x2c   : > { %4197 = vmatprep.mubr.msk.bf16.mxu1 %vm533_vm2, %v492_v17  ;;  %v436_v26 = vsel %vm400_vm1, %v431_v11, %v435_v13  ;;  %v439_v27 = vor.u32 %v437_v8, %v435_v13  ;;  %v443_v28 = vrot.slane %v441_v14, 1  ;;  %v449_v34 = vshll.u32 %v4744_v20, 16  ;;  %4487 = vmatprep.subr.msk.bf16.mxu1 %vm582_vm0, %v3814_v61 }
  0x2d   : > { %v500_v32 = vsel %vm400_vm1, %v495_v18, %v499_v19  ;;  %v503_v33 = vor.u32 %v501_v16, %v499_v19  ;;  %v509_v35 = vshrl.u32 %v4740_v15, 16  ;;  %v507_v37 = vrot.slane %v505_v31, 1  ;;  %4488 = vmatprep.subr.msk.bf16.mxu0 %vm582_vm0, %v3848_v62  ;;  %v4820_v31 = vld [vmem:[%s5982_s1 + $0x18] sm:$0xf] }
  0x2e   : > { %v444_v36 = vsel %vm400_vm1, %v439_v27, %v443_v28  ;;  %v513_v40 = vshll.u32 %v4747_v25, 16  ;;  %v447_v45 = vor.u32 %v445_v22, %v443_v28  ;;  %v451_v46 = vrot.slane %v449_v34, 1  ;;  %v4812_v28 = vld [vmem:[%s5982_s1 + $0x14] sm:$0xf] }
  0x2f   : > { %v453_v47 = vshrl.u32 %v4744_v20, 16  ;;  %v517_v48 = vshrl.u32 %v4747_v25, 16  ;;  %v508_v49 = vsel %vm400_vm1, %v503_v33, %v507_v37  ;;  %v511_v50 = vor.u32 %v509_v35, %v507_v37 }
  0x30   : > { %v515_v51 = vrot.slane %v513_v40, 1  ;;  %v457_v52 = vshll.u32 %v4757_v41, 16  ;;  %v521_v54 = vshll.u32 %v4759_v42, 16  ;;  %v452_v0 = vsel %vm400_vm1, %v447_v45, %v451_v46  ;;  %v4851_v40 = vld [vmem:[#allocation2 + $0x10] sm:$0xff]   ;;  %v2025_v45 = vld [vmem:[#allocation2 + $0x8] sm:$0xc] }
  0x31   : > { %4198 = vmatmul.mubr.msk.bf16.gmra.mxu1 %vm533_vm2, %v500_v32  ;;  %v455_v53 = vor.u32 %v453_v47, %v451_v46  ;;  %v461_v2 = vshrl.u32 %v4757_v41, 16  ;;  %v525_v5 = vshrl.u32 %v4759_v42, 16  ;;  %v529_v6 = vshll.u32 %v4770_v55, 16  ;;  %v1228_v47 = vld [vmem:[#allocation2 + $0xc] sm:$0xf] }
  0x32   : > { %4182 = vmatmul.mubr.msk.bf16.gmra.mxu0 %vm533_vm2, %v436_v26  ;;  %4201 = vmatprep.mubr.msk.bf16.mxu1 %vm533_vm2, %v508_v49  ;;  %v459_v58 = vrot.slane %v457_v52, 1  ;;  %v519_v60 = vor.u32 %v517_v48, %v515_v51  ;;  %v523_v63 = vrot.slane %v521_v54, 1  ;;  %v516_v1 = vsel %vm400_vm1, %v511_v50, %v515_v51  ;;  %v4854_v48 = vld [vmem:[#allocation2 + $0x18] sm:$0xff]   ;;  %v4866_v52 = vld [vmem:[#allocation2 + $0x20] sm:$0xff]  }
  0x33   : > { %4185 = vmatprep.mubr.msk.bf16.mxu0 %vm533_vm2, %v444_v36  ;;  %v3797_v8 = vcombine.low %v943_v56, %v4669_v21  ;;  %v531_v12 = vrot.slane %v529_v6, 1  ;;  %v951_v14 = vrot.slane %v4677_v24, 1  ;;  %vm949_vm3 = vcmask 1046528   ;;  %v4870_v56 = vld [vmem:[#allocation2 + $0x30] sm:$0xff]  }
  0x34   : > { %v460_v3 = vsel %vm400_vm1, %v455_v53, %v459_v58  ;;  %v524_v9 = vsel %vm400_vm1, %v519_v60, %v523_v63  ;;  %v463_v10 = vor.u32 %v461_v2, %v459_v58  ;;  %v527_v11 = vor.u32 %v525_v5, %v523_v63  ;;  %v4868_v53 = vld [vmem:[#allocation2 + $0x28] sm:$0xff]   ;;  %v4875_v58 = vld [vmem:[#allocation2 + $0x38] sm:$0xff]   ;;  %v4893_v6 = vld [vmem:[#allocation2 + $0x50] sm:$0xff]  }
  0x35   : > { %v950_v13 = vrot.slane %v3797_v8, 1  ;;  %v953_v18 = vrot.slane %v4695_v38, 1  ;;  %v955_v19 = vrot.slane %v4700_v43, 1  ;;  %v1427_v26 = vsel %vm582_vm0, %v3814_v61, 0  ;;  %v4891_v5 = vld [vmem:[#allocation2 + $0x48] sm:$0xff]  }
  0x36   : > { %v468_v21 = vsel %vm400_vm1, %v463_v10, %v4702_v44  ;;  %v532_v16 = vsel %vm400_vm1, %v527_v11, %v531_v12  ;;  %v1830_v44 = vsel %vm582_vm0, %v3848_v62, 0  ;;  %v959_v32 = vrot.slane %v4733_v7, 1  ;;  %v4902_v10 = vld [vmem:[#allocation2 + $0x58] sm:$0xff]  }
  0x37   : > { %v952_v17 = vsel %vm949_vm3, %v950_v13, %v951_v14  ;;  %v954_v22 = vsel %vm949_vm3, %v951_v14, %v953_v18  ;;  %v956_v27 = vsel %vm949_vm3, %v953_v18, %v955_v19  ;;  %v963_v34 = vrot.slane %v4757_v41, 1 }
  0x38   : > { %vm2031_vm4 = vcmask 1045504   ;;  %v2033_v49 = vrot.slane %v4851_v40, 2  ;;  %v2035_v50 = vrot.slane %v4854_v48, 2  ;;  %v971_v51 = vrot.slane %v4716_v57, 1 }
  0x39   : > { %4202 = vmatmul.mubr.msk.bf16.gmra.mxu1 %vm533_vm2, %v516_v1  ;;  %v2037_v61 = vrot.slane %v4866_v52, 2  ;;  %v2039_v62 = vrot.slane %v4868_v53, 2  ;;  %v2041_v63 = vrot.slane %v4870_v56, 2  ;;  %v4885_v1 = vld [vmem:[#allocation2 + $0x40] sm:$0xff]   ;;  %v973_v13 = vrot.slane %v4728_v4, 1 }
  0x3a   : > { %4186 = vmatmul.mubr.msk.bf16.gmra.mxu0 %vm533_vm2, %v452_v0  ;;  %4205 = vmatprep.mubr.msk.bf16.mxu1 %vm533_vm2, %v524_v9  ;;  %v2045_v12 = vrot.slane %v4885_v1, 2  ;;  %v2047_v14 = vrot.slane %v4891_v5, 2  ;;  %v2051_v18 = vrot.slane %v4902_v10, 2  ;;  %vm1628_vm5 = vsmask.f32 6400 }
  0x3b   : > { %4189 = vmatprep.mubr.msk.bf16.mxu0 %vm533_vm2, %v460_v3  ;;  %v4888_v2 = vsel %vm2031_vm4, %v2035_v50, %v2037_v61  ;;  %v2043_v3 = vrot.slane %v4875_v58, 2  ;;  %v4896_v8 = vsel %vm2031_vm4, %v2037_v61, %v2039_v62  ;;  %v4899_v9 = vsel %vm2031_vm4, %v2039_v62, %v2041_v63 }
  0x3c   : > { %v981_v62 = vrot.slane %v4770_v55, 1  ;;  %v4982_v55 = vld [vmem:[#allocation2 + $0x88] ss:$0 sps:$4 sm:$0x33]   ;;  %vm3113_vm6 = vcmask 1044480   ;;  %vm3590_vm8 = vcmask 519168  }
  0x3d   : > { %v4905_v11 = vsel %vm2031_vm4, %v2041_v63, %v2043_v3  ;;  %v1647_v63 = vshrl.u32 %v4854_v48, 16  ;;  %vm2710_vm7 = vsmask.f32 5376 }
  0x41   : > { %4206 = vmatmul.mubr.msk.bf16.gmra.mxu1 %vm533_vm2, %v532_v16  ;;  %v975_v16 = vrot.slane %v4740_v15, 1 }
  0x42   : > { %4190 = vmatmul.mubr.msk.bf16.gmra.mxu0 %vm533_vm2, %v468_v21  ;;  %4211 = vmatprep.mubr.msk.bf16.mxu1 %vm533_vm2, %v4675_v23  ;;  %v957_v23 = vrot.slane %v4719_v59, 1  ;;  %v2049_v21 = vrot.slane %v4893_v6, 2 }
  0x43   : > { %4245 = vmatprep.mubr.msk.bf16.mxu0 %vm533_vm2, %v952_v17  ;;  %v4918_v17 = vsel %vm2031_vm4, %v2043_v3, %v2045_v12 }
  0x44   : > { %v960_v33 = vsel %vm949_vm3, %v957_v23, %v959_v32 }
  0x49   : > { %4212 = vmatmul.mubr.msk.bf16.vlgmr.msra.gmra.mxu1 %vm533_vm2, %v4677_v24  ;;  %v958_v24 = vsel %vm949_vm3, %v955_v19, %v957_v23  ;;  %v1227_v19 = vld [vmem:[#allocation2 + $0x8] sm:$0xe] }
  0x4a   : > { %4246 = vmatmul.mubr.msk.bf16.vlgmr.msra.gmra.mxu0 %vm533_vm2, %v954_v22  ;;  %4278 = vmatpush3.bf16.msra.mxu1 %v1427_v26  ;;  %v4924_v22 = vsel %vm2031_vm4, %v2045_v12, %v2047_v14  ;;  %v4929_v26 = vld [vmem:[#allocation2 + $0x68] sm:$0xff]  }
  0x4b   : > { %4312 = vmatpush3.bf16.msra.mxu0 %v1830_v44  ;;  %4215 = vmatprep.mubr.msk.bf16.mxu1 %vm533_vm2, %v4695_v38  ;;  %v961_v38 = vrot.slane %v4744_v20, 1  ;;  %v4927_v44 = vsel %vm2031_vm4, %v2047_v14, %v2049_v21  ;;  %v1346_v14 = vrot.slane %v4851_v40, 1 }
  0x4c   : > { %4249 = vmatprep.mubr.msk.bf16.mxu0 %vm533_vm2, %v956_v27  ;;  %4489 = vmatprep.subr.msk.bf16.mxu1 %vm582_vm0, %v4812_v28  ;;  %v974_v27 = vsel %vm949_vm3, %v971_v51, %v973_v13 }
  0x4d   : > { %4490 = vmatprep.subr.msk.bf16.mxu0 %vm582_vm0, %v4820_v31  ;;  %v962_v35 = vsel %vm949_vm3, %v959_v32, %v961_v38  ;;  %v964_v36 = vsel %vm949_vm3, %v961_v38, %v963_v34  ;;  %v976_v32 = vsel %vm949_vm3, %v973_v13, %v975_v16 }
  0x51   : > { %4216 = vmatmul.mubr.msk.bf16.gmra.mxu1 %vm533_vm2, %v4700_v43  ;;  %v965_v43 = vrot.slane %v4683_v29, 1 }
  0x52   : > { %4250 = vmatmul.mubr.msk.bf16.gmra.mxu0 %vm533_vm2, %v958_v24  ;;  %4219 = vmatprep.mubr.msk.bf16.mxu1 %vm533_vm2, %v4719_v59  ;;  %v967_v59 = vrot.slane %v4685_v30, 1  ;;  %v3815_v24 = vcombine.low %v1227_v19, %v1228_v47  ;;  %v1649_v19 = vrot.slane %v1647_v63, 1 }
  0x53   : > { %4253 = vmatprep.mubr.msk.bf16.mxu0 %vm533_vm2, %v960_v33  ;;  %v966_v37 = vsel %vm949_vm3, %v963_v34, %v965_v43  ;;  %v2055_v33 = vrot.slane %v4929_v26, 2 }
  0x54   : > { %v968_v46 = vsel %vm949_vm3, %v965_v43, %v967_v59  ;;  %v1638_v43 = vshrl.u32 %v4851_v40, 16  ;;  %v1345_v13 = vrot.slane %v3815_v24, 1 }
  0x59   : > { %4220 = vmatmul.mubr.msk.bf16.gmra.mxu1 %vm533_vm2, %v4733_v7  ;;  %v3867_v7 = vcombine.low %v2025_v45, %v1228_v47  ;;  %v1641_v45 = vshll.u32 %v4851_v40, 16  ;;  %v4956_v47 = vld [vmem:[#allocation2 + $0x78] sm:$0xff]   ;;  %v1347_v40 = vsel %vm949_vm3, %v1345_v13, %v1346_v14 }
  0x5a   : > { %4254 = vmatmul.mubr.msk.bf16.gmra.mxu0 %vm533_vm2, %v962_v35  ;;  %4223 = vmatprep.mubr.msk.bf16.mxu1 %vm533_vm2, %v4744_v20  ;;  %v969_v20 = vrot.slane %v4697_v39, 1  ;;  %v977_v35 = vrot.slane %v4747_v25, 1 }
  0x5b   : > { %4257 = vmatprep.mubr.msk.bf16.mxu0 %vm533_vm2, %v964_v36  ;;  %v2032_v54 = vrot.slane %v3867_v7, 2  ;;  %v979_v36 = vrot.slane %v4759_v42, 1 }
  0x5c   : > { %v972_v0 = vsel %vm949_vm3, %v969_v20, %v971_v51 }
  0x5d   : > { %v4878_v60 = vsel %vm2031_vm4, %v2032_v54, %v2033_v49  ;;  %v980_v7 = vsel %vm949_vm3, %v977_v35, %v979_v36  ;;  %v1643_v54 = vrot.slane %v1641_v45, 2 }
  0x61   : > { %4224 = vmatmul.mubr.msk.bf16.gmra.mxu1 %vm533_vm2, %v4757_v41  ;;  %v4873_v41 = vsel %vm2031_vm4, %v2033_v49, %v2035_v50  ;;  %v1640_v49 = vrot.slane %v1638_v43, 1 }
  0x62   : > { %4258 = vmatmul.mubr.msk.bf16.gmra.mxu0 %vm533_vm2, %v966_v37  ;;  %4227 = vmatprep.mubr.msk.bf16.mxu1 %vm533_vm2, %v4683_v29  ;;  %v970_v29 = vsel %vm949_vm3, %v967_v59, %v969_v20  ;;  %v1630_v59 = vshrl.u32 %v3815_v24, 16  ;;  %v1633_v37 = vshll.u32 %v3815_v24, 16  ;;  %v1665_v24 = vshrl.u32 %v4868_v53, 16 }
  0x63   : > { %4261 = vmatprep.mubr.msk.bf16.mxu0 %vm533_vm2, %v968_v46  ;;  %v4954_v46 = vld [vmem:[#allocation2 + $0x70] sm:$0xff]   ;;  %v1644_v12 = vor.u32 %v1643_v54, %v1640_v49  ;;  %v1350_v49 = vrot.slane %v4866_v52, 1 }
  0x64   : > { %v2057_v20 = vrot.slane %v4954_v46, 2  ;;  %v1632_v50 = vrot.slane %v1630_v59, 1  ;;  %v1635_v51 = vrot.slane %v1633_v37, 2  ;;  %v1348_v37 = vrot.slane %v4854_v48, 1 }
  0x65   : > { %v1667_v54 = vrot.slane %v1665_v24, 1  ;;  %v5040_v24 = vld [vmem:[%s5982_s1 + $0x20] sm:$0xf] }
  0x66   : > { %v4963_v61 = vsel %vm2031_vm4, %v2055_v33, %v2057_v20  ;;  %v1636_v3 = vor.u32 %v1635_v51, %v1632_v50  ;;  %v3107_v50 = vld [vmem:[#allocation2 + $0x10] sm:$0x8] }
  0x69   : > { %4228 = vmatmul.mubr.msk.bf16.gmra.mxu1 %vm533_vm2, %v4685_v30  ;;  %v4921_v30 = vld [vmem:[#allocation2 + $0x60] sm:$0xff]  }
  0x6a   : > { %4262 = vmatmul.mubr.msk.bf16.gmra.mxu0 %vm533_vm2, %v970_v29  ;;  %4231 = vmatprep.mubr.msk.bf16.mxu1 %vm533_vm2, %v4697_v39  ;;  %v4932_v39 = vsel %vm2031_vm4, %v2049_v21, %v2051_v18  ;;  %v2053_v23 = vrot.slane %v4921_v30, 2  ;;  %v4978_v21 = vld [vmem:[#allocation2 + $0x80] sm:$0xff]  }
  0x6b   : > { %4265 = vmatprep.mubr.msk.bf16.mxu0 %vm533_vm2, %v972_v0  ;;  %v1650_v0 = vshll.u32 %v4854_v48, 16  ;;  %v1349_v48 = vsel %vm949_vm3, %v1346_v14, %v1348_v37 }
  0x6c   : > { %v4939_v38 = vsel %vm2031_vm4, %v2051_v18, %v2053_v23  ;;  %v4943_v34 = vsel %vm2031_vm4, %v2053_v23, %v2055_v33  ;;  %v982_v18 = vsel %vm949_vm3, %v979_v36, %v981_v62  ;;  %v1645_v23 = vsel %vm1628_vm5, %v1636_v3, %v1644_v12  ;;  %v5015_v3 = vld [vmem:[#allocation2 + $0x20] sm:$0xff]  }
  0x6d   : > { %v1668_v36 = vshll.u32 %v4868_v53, 16  ;;  %v5987_v14 = vrot.slane %v5015_v3, 3 }
  0x71   : > { %4232 = vmatmul.mubr.msk.bf16.gmra.mxu1 %vm533_vm2, %v4716_v57  ;;  %v978_v57 = vsel %vm949_vm3, %v975_v16, %v977_v35  ;;  %v1659_v16 = vshll.u32 %v4866_v52, 16 }
  0x72   : > { %4266 = vmatmul.mubr.msk.bf16.gmra.mxu0 %vm533_vm2, %v974_v27  ;;  %4235 = vmatprep.mubr.msk.bf16.mxu1 %vm533_vm2, %v4728_v4  ;;  %v2059_v4 = vrot.slane %v4956_v47, 2  ;;  %v1652_v27 = vrot.slane %v1650_v0, 2  ;;  %v2509_v0 = vsel %vm582_vm0, %v4820_v31, 0 }
  0x73   : > { %4269 = vmatprep.mubr.msk.bf16.mxu0 %vm533_vm2, %v976_v32  ;;  %v2063_v32 = vrot.slane %v4982_v55, 2  ;;  %v1661_v43 = vrot.slane %v1659_v16, 2 }
  0x74   : > { %v4967_v29 = vsel %vm2031_vm4, %v2057_v20, %v2059_v4  ;;  %v1653_v45 = vor.u32 %v1652_v27, %v1649_v19  ;;  %v5006_v20 = vld [vmem:[#allocation2 + $0x14] sm:$0xf]  ;;  %v1351_v19 = vsel %vm949_vm3, %v1348_v37, %v1350_v49  ;;  %v1683_v27 = vshrl.u32 %v4875_v58, 16 }
  0x75   : > { %v3937_v62 = vcombine.low %v3107_v50, %v5006_v20  ;;  %v1354_v37 = vrot.slane %v4870_v56, 1 }
  0x76   : > { %v1654_v63 = vsel %vm1628_vm5, %v1644_v12, %v1653_v45 }
  0x79   : > { %4236 = vmatmul.mubr.msk.bf16.gmra.mxu1 %vm533_vm2, %v4740_v15  ;;  %v1656_v15 = vshrl.u32 %v4866_v52, 16 }
  0x7a   : > { %4270 = vmatmul.mubr.msk.bf16.gmra.mxu0 %vm533_vm2, %v978_v57  ;;  %4239 = vmatprep.mubr.msk.bf16.mxu1 %vm533_vm2, %v4747_v25  ;;  %v2061_v25 = vrot.slane %v4978_v21, 2  ;;  %v1674_v57 = vshrl.u32 %v4870_v56, 16 }
  0x7b   : > { %4273 = vmatprep.mubr.msk.bf16.mxu0 %vm533_vm2, %v980_v7  ;;  %v1658_v35 = vrot.slane %v1656_v15, 1  ;;  %v1677_v7 = vshll.u32 %v4870_v56, 16  ;;  %v3114_v15 = vrot.slane %v3937_v62, 3  ;;  %v1356_v56 = vrot.slane %v4875_v58, 1 }
  0x7c   : > { %v4991_v33 = vsel %vm2031_vm4, %v2059_v4, %v2061_v25  ;;  %v4996_v59 = vsel %vm2031_vm4, %v2061_v25, %v2063_v32  ;;  %v1670_v4 = vrot.slane %v1668_v36, 2  ;;  %v1676_v52 = vrot.slane %v1674_v57, 1  ;;  %v5028_v25 = vld [vmem:[%s5982_s1 + $0x1c] sm:$0xf] }
  0x7d   : > { %v1662_v51 = vor.u32 %v1661_v43, %v1658_v35  ;;  %v1679_v13 = vrot.slane %v1677_v7, 2  ;;  %v1692_v32 = vshrl.u32 %v4885_v1, 16  ;;  %v1352_v43 = vrot.slane %v4868_v53, 1 }
  0x7e   : > { %v1671_v31 = vor.u32 %v1670_v4, %v1667_v54  ;;  %v1685_v57 = vrot.slane %v1683_v27, 1  ;;  %v5076_v27 = vld [vmem:[#allocation2 + $0x40] sm:$0xff]  }
  0x7f   : > { %v1663_v12 = vsel %vm1628_vm5, %v1653_v45, %v1662_v51  ;;  %v1680_v36 = vor.u32 %v1679_v13, %v1676_v52  ;;  %v1694_v50 = vrot.slane %v1692_v32, 1  ;;  %v1353_v4 = vsel %vm949_vm3, %v1350_v49, %v1352_v43 }
  0x80   : > { %v1672_v45 = vsel %vm1628_vm5, %v1662_v51, %v1671_v31  ;;  %v1355_v62 = vsel %vm949_vm3, %v1352_v43, %v1354_v37  ;;  %v1710_v49 = vshrl.u32 %v4893_v6, 16  ;;  %v1713_v52 = vshll.u32 %v4893_v6, 16 }
  0x81   : > { %4240 = vmatmul.mubr.msk.bf16.gmra.mxu1 %vm533_vm2, %v4759_v42  ;;  %v5008_v42 = vld [vmem:[#allocation2 + $0x18] sm:$0xff]   ;;  %v1681_v53 = vsel %vm1628_vm5, %v1671_v31, %v1680_v36  ;;  %v1358_v13 = vrot.slane %v4885_v1, 1 }
  0x82   : > { %4274 = vmatmul.mubr.msk.bf16.gmra.mxu0 %vm533_vm2, %v982_v18  ;;  %4279 = vmatprep.mubr.msk.bf16.mxu1 %vm533_vm2, %v1347_v40  ;;  %v3115_v16 = vrot.slane %v5008_v42, 3  ;;  %v2114_v18 = vsel %vm582_vm0, %v4812_v28, 0  ;;  %v1686_v28 = vshll.u32 %v4875_v58, 16  ;;  %v1695_v40 = vshll.u32 %v4885_v1, 16 }
  0x83   : > { %4313 = vmatprep.mubr.msk.bf16.mxu0 %vm533_vm2, %v1645_v23  ;;  %v1357_v58 = vsel %vm949_vm3, %v1354_v37, %v1356_v56  ;;  %v1715_v32 = vrot.slane %v1713_v52, 2  ;;  %v1359_v43 = vsel %vm949_vm3, %v1356_v56, %v1358_v13  ;;  %v3125_v37 = vrot.slane %v5076_v27, 3  ;;  %v5100_v56 = vld [vmem:[#allocation2 + $0x48] sm:$0xff]   ;;  %v5104_v52 = vld [vmem:[#allocation2 + $0x50] sm:$0xff]  }
  0x84   : > { %v5031_v23 = vsel %vm3113_vm6, %v3114_v15, %v3115_v16  ;;  %v5045_v35 = vsel %vm3113_vm6, %v3115_v16, %v5987_v14  ;;  %v1688_v7 = vrot.slane %v1686_v28, 2  ;;  %v1697_v54 = vrot.slane %v1695_v40, 2  ;;  %v5070_v15 = vld [vmem:[#allocation2 + $0x30] sm:$0xff]   ;;  %v5072_v16 = vld [vmem:[#allocation2 + $0x38] sm:$0xff]  }
  0x85   : > { %v1712_v28 = vrot.slane %v1710_v49, 1  ;;  %v5985_v40 = vrot.slane %v5070_v15, 3  ;;  %v3123_v1 = vrot.slane %v5072_v16, 3 }
  0x86   : > { %v1689_v51 = vor.u32 %v1688_v7, %v1685_v57  ;;  %v1719_v7 = vshrl.u32 %v4902_v10, 16 }
  0x89   : > { %4280 = vmatmul.mubr.msk.bf16.vlgmr.msra.gmra.mxu1 %vm533_vm2, %v1349_v48  ;;  %v1698_v48 = vor.u32 %v1697_v54, %v1694_v50  ;;  %v1722_v50 = vshll.u32 %v4902_v10, 16  ;;  %v5094_v54 = vsel %vm3113_vm6, %v3123_v1, %v3125_v37 }
  0x8a   : > { %4314 = vmatmul.mubr.msk.bf16.vlgmr.msra.gmra.mxu0 %vm533_vm2, %v1654_v63  ;;  %4346 = vmatpush3.bf16.msra.mxu1 %v2114_v18  ;;  %v1701_v63 = vshrl.u32 %v4891_v5, 16  ;;  %v1690_v18 = vsel %vm1628_vm5, %v1680_v36, %v1689_v51  ;;  %v1360_v36 = vrot.slane %v4891_v5, 1 }
  0x8b   : > { %4380 = vmatpush3.bf16.msra.mxu0 %v2509_v0  ;;  %4283 = vmatprep.mubr.msk.bf16.mxu1 %vm533_vm2, %v1351_v19  ;;  %v1704_v0 = vshll.u32 %v4891_v5, 16  ;;  %v1699_v19 = vsel %vm1628_vm5, %v1689_v51, %v1698_v48  ;;  %v1716_v5 = vor.u32 %v1715_v32, %v1712_v28  ;;  %v1724_v49 = vrot.slane %v1722_v50, 2 }
  0x8c   : > { %4317 = vmatprep.mubr.msk.bf16.mxu0 %vm533_vm2, %v1663_v12  ;;  %4491 = vmatprep.subr.msk.bf16.mxu1 %vm582_vm0, %v5028_v25  ;;  %v1703_v12 = vrot.slane %v1701_v63, 1  ;;  %v1361_v51 = vsel %vm949_vm3, %v1358_v13, %v1360_v36  ;;  %v1364_v13 = vrot.slane %v4902_v10, 1  ;;  %v1737_v32 = vshrl.u32 %v4929_v26, 16 }
  0x8d   : > { %4492 = vmatprep.subr.msk.bf16.mxu0 %vm582_vm0, %v5040_v24  ;;  %v1706_v31 = vrot.slane %v1704_v0, 2  ;;  %v1721_v0 = vrot.slane %v1719_v7, 1  ;;  %v1746_v10 = vshrl.u32 %v4954_v46, 16  ;;  %v5126_v7 = vld [vmem:[#allocation2 + $0x58] sm:$0xff]  }
  0x8f   : > { %v1707_v57 = vor.u32 %v1706_v31, %v1703_v12  ;;  %v3127_v12 = vrot.slane %v5100_v56, 3  ;;  %v1725_v28 = vor.u32 %v1724_v49, %v1721_v0  ;;  %v1748_v49 = vrot.slane %v1746_v10, 1  ;;  %v5152_v10 = vld [vmem:[#allocation2 + $0x68] sm:$0xff]  }
  0x91   : > { %4284 = vmatmul.mubr.msk.bf16.gmra.mxu1 %vm533_vm2, %v1353_v4  ;;  %v1728_v4 = vshrl.u32 %v4921_v30, 16  ;;  %v1708_v63 = vsel %vm1628_vm5, %v1698_v48, %v1707_v57  ;;  %v5113_v48 = vsel %vm3113_vm6, %v3125_v37, %v3127_v12  ;;  %v1749_v37 = vshll.u32 %v4954_v46, 16 }
  0x92   : > { %4318 = vmatmul.mubr.msk.bf16.gmra.mxu0 %vm533_vm2, %v1672_v45  ;;  %4287 = vmatprep.mubr.msk.bf16.mxu1 %vm533_vm2, %v1355_v62  ;;  %v5087_v45 = vsel %vm3113_vm6, %v5985_v40, %v3123_v1  ;;  %v1362_v62 = vrot.slane %v4893_v6, 1  ;;  %v3129_v6 = vrot.slane %v5104_v52, 3  ;;  %v1740_v1 = vshll.u32 %v4929_v26, 16  ;;  %v4551_v40 = vld [vmem:[#allocation2 + $0x88] ss:$0 sps:$4 sm:$0x11]  }
  0x93   : > { %4321 = vmatprep.mubr.msk.bf16.mxu0 %vm533_vm2, %v1681_v53  ;;  %v1731_v53 = vshll.u32 %v4921_v30, 16 }
  0x94   : > { %v1363_v31 = vsel %vm949_vm3, %v1360_v36, %v1362_v62  ;;  %v1365_v50 = vsel %vm949_vm3, %v1362_v62, %v1364_v13  ;;  %v1368_v62 = vrot.slane %v4929_v26, 1  ;;  %v1764_v26 = vshrl.u32 %v4978_v21, 16 }
  0x99   : > { %4288 = vmatmul.mubr.msk.bf16.gmra.mxu1 %vm533_vm2, %v1357_v58  ;;  %v1717_v58 = vsel %vm1628_vm5, %v1707_v57, %v1716_v5  ;;  %v1366_v57 = vrot.slane %v4921_v30, 1 }
  0x9a   : > { %4322 = vmatmul.mubr.msk.bf16.gmra.mxu0 %vm533_vm2, %v1690_v18  ;;  %4291 = vmatprep.mubr.msk.bf16.mxu1 %vm533_vm2, %v1359_v43  ;;  %v1730_v18 = vrot.slane %v1728_v4, 1  ;;  %v5120_v43 = vsel %vm3113_vm6, %v3127_v12, %v3129_v6  ;;  %v1726_v4 = vsel %vm1628_vm5, %v1716_v5, %v1725_v28 }
  0x9b   : > { %4325 = vmatprep.mubr.msk.bf16.mxu0 %vm533_vm2, %v1699_v19  ;;  %v1733_v19 = vrot.slane %v1731_v53, 2  ;;  %v1739_v53 = vrot.slane %v1737_v32, 1 }
  0x9d   : > { %v1734_v36 = vor.u32 %v1733_v19, %v1730_v18  ;;  %v3131_v18 = vrot.slane %v5126_v7, 3  ;;  %v1367_v19 = vsel %vm949_vm3, %v1364_v13, %v1366_v57 }
  0x9f   : > { %v1735_v0 = vsel %vm1628_vm5, %v1725_v28, %v1734_v36  ;;  %v5139_v5 = vsel %vm3113_vm6, %v3129_v6, %v3131_v18  ;;  %v1758_v28 = vshll.u32 %v4956_v47, 16  ;;  %v1767_v6 = vshll.u32 %v4978_v21, 16 }
  0xa1   : > { %4292 = vmatmul.mubr.msk.bf16.gmra.mxu1 %vm533_vm2, %v1361_v51  ;;  %v1742_v51 = vrot.slane %v1740_v1, 2  ;;  %v1370_v1 = vrot.slane %v4954_v46, 1 }
  0xa2   : > { %4326 = vmatmul.mubr.msk.bf16.gmra.mxu0 %vm533_vm2, %v1708_v63  ;;  %4295 = vmatprep.mubr.msk.bf16.mxu1 %vm533_vm2, %v1363_v31  ;;  %v5130_v63 = vld [vmem:[#allocation2 + $0x60] sm:$0xff]   ;;  %v1755_v31 = vshrl.u32 %v4956_v47, 16 }
  0xa3   : > { %4329 = vmatprep.mubr.msk.bf16.mxu0 %vm533_vm2, %v1717_v58  ;;  %v1751_v58 = vrot.slane %v1749_v37, 2  ;;  %v3133_v30 = vrot.slane %v5130_v63, 3  ;;  %v1743_v12 = vor.u32 %v1742_v51, %v1739_v53  ;;  %v1369_v37 = vsel %vm949_vm3, %v1366_v57, %v1368_v62  ;;  %v5156_v51 = vld [vmem:[#allocation2 + $0x70] sm:$0xff]  }
  0xa4   : > { %v1760_v53 = vrot.slane %v1758_v28, 2  ;;  %v3137_v46 = vrot.slane %v5156_v51, 3 }
  0xa5   : > { %v5146_v13 = vsel %vm3113_vm6, %v3131_v18, %v3133_v30  ;;  %v1752_v32 = vor.u32 %v1751_v58, %v1748_v49  ;;  %v1766_v18 = vrot.slane %v1764_v26, 1  ;;  %v1769_v49 = vrot.slane %v1767_v6, 2  ;;  %v2309_v6 = vld [vmem:[#allocation2 + $0x10] sm:$0xc] }
  0xa6   : > { %v3135_v58 = vrot.slane %v5152_v10, 3 }
  0xa7   : > { %v1770_v26 = vor.u32 %v1769_v49, %v1766_v18 }
  0xa8   : > { %v5164_v57 = vsel %vm3113_vm6, %v3133_v30, %v3135_v58  ;;  %v5171_v28 = vsel %vm3113_vm6, %v3135_v58, %v3137_v46  ;;  %v1374_v30 = vrot.slane %v4978_v21, 1 }
  0xa9   : > { %4296 = vmatmul.mubr.msk.bf16.gmra.mxu1 %vm533_vm2, %v1365_v50  ;;  %v1744_v50 = vsel %vm1628_vm5, %v1734_v36, %v1743_v12 }
  0xaa   : > { %4330 = vmatmul.mubr.msk.bf16.gmra.mxu0 %vm533_vm2, %v1726_v4  ;;  %4299 = vmatprep.mubr.msk.bf16.mxu1 %vm533_vm2, %v1367_v19  ;;  %v1757_v4 = vrot.slane %v1755_v31, 1  ;;  %v1371_v19 = vsel %vm949_vm3, %v1368_v62, %v1370_v1  ;;  %v1776_v31 = vshll.u32 %v4982_v55, 16  ;;  %v1372_v62 = vrot.slane %v4956_v47, 1 }
  0xab   : > { %4333 = vmatprep.mubr.msk.bf16.mxu0 %vm533_vm2, %v1735_v0  ;;  %v1753_v0 = vsel %vm1628_vm5, %v1743_v12, %v1752_v32  ;;  %v1773_v12 = vshrl.u32 %v4982_v55, 16 }
  0xac   : > { %v1761_v36 = vor.u32 %v1760_v53, %v1757_v4  ;;  %v1778_v53 = vrot.slane %v1776_v31, 2  ;;  %v1373_v55 = vsel %vm949_vm3, %v1370_v1, %v1372_v62  ;;  %v1375_v21 = vsel %vm949_vm3, %v1372_v62, %v1374_v30  ;;  %v5201_v31 = vld [vmem:[#allocation2 + $0x88] sm:$0xff]  }
  0xad   : > { %v1775_v4 = vrot.slane %v1773_v12, 1  ;;  %v2428_v12 = vrot.slane %v5008_v42, 2 }
  0xae   : > { %v1771_v58 = vsel %vm1628_vm5, %v1761_v36, %v1770_v26 }
  0xaf   : > { %v1779_v1 = vor.u32 %v1778_v53, %v1775_v4  ;;  %v5208_v4 = vld [vmem:[#allocation2 + $0x28] sm:$0xff]  }
  0xb1   : > { %4300 = vmatmul.mubr.msk.bf16.gmra.mxu1 %vm533_vm2, %v1369_v37  ;;  %v1762_v37 = vsel %vm1628_vm5, %v1752_v32, %v1761_v36 }
  0xb2   : > { %4334 = vmatmul.mubr.msk.bf16.gmra.mxu0 %vm533_vm2, %v1744_v50  ;;  %4303 = vmatprep.mubr.msk.bf16.mxu1 %vm533_vm2, %v1371_v19  ;;  %v5176_v50 = vld [vmem:[#allocation2 + $0x78] sm:$0xff]   ;;  %v5184_v19 = vcombine.low %v2309_v6, %v5006_v20  ;;  %v1376_v20 = vrot.slane %v4551_v40, 1 }
  0xb3   : > { %4337 = vmatprep.mubr.msk.bf16.mxu0 %vm533_vm2, %v1753_v0  ;;  %v5179_v0 = vld [vmem:[#allocation2 + $0x80] sm:$0xff]   ;;  %v3139_v47 = vrot.slane %v5176_v50, 3 }
  0xb4   : > { %v3141_v18 = vrot.slane %v5179_v0, 3  ;;  %v2427_v36 = vrot.slane %v5184_v19, 2  ;;  %v1377_v62 = vsel %vm949_vm3, %v1374_v30, %v1376_v20  ;;  %v2432_v30 = vrot.slane %v5208_v4, 2 }
  0xb5   : > { %v5191_v32 = vsel %vm3113_vm6, %v3137_v46, %v3139_v47  ;;  %v1780_v46 = vsel %vm1628_vm5, %v1770_v26, %v1779_v1  ;;  %v2430_v26 = vrot.slane %v5015_v3, 2 }
  0xb6   : > { %v5196_v49 = vsel %vm3113_vm6, %v3139_v47, %v3141_v18  ;;  %v2429_v6 = vsel %vm2031_vm4, %v2427_v36, %v2428_v12 }
  0xb7   : > { %5988 = vst [vmem:[#allocation6_spill] sm:$0xff] %v5196_v49  ;;  %v2431_v53 = vsel %vm2031_vm4, %v2428_v12, %v2430_v26  ;;  %v2433_v47 = vsel %vm2031_vm4, %v2430_v26, %v2432_v30  ;;  %v2452_v26 = vrot.slane %v5176_v50, 2 }
  0xb9   : > { %4304 = vmatmul.mubr.msk.bf16.gmra.mxu1 %vm533_vm2, %v1373_v55  ;;  %v3196_v55 = vsel %vm582_vm0, %v5040_v24, 0 }
  0xba   : > { %4338 = vmatmul.mubr.msk.bf16.gmra.mxu0 %vm533_vm2, %v1762_v37  ;;  %4307 = vmatprep.mubr.msk.bf16.mxu1 %vm533_vm2, %v1375_v21  ;;  %v5986_v37 = vrot.slane %v5201_v31, 3  ;;  %v2436_v21 = vrot.slane %v5072_v16, 2 }
  0xbb   : > { %4341 = vmatprep.mubr.msk.bf16.mxu0 %vm533_vm2, %v1771_v58  ;;  %v2912_v58 = vsel %vm582_vm0, %v5028_v25, 0 }
  0xbc   : > { %v5213_v40 = vsel %vm3113_vm6, %v3141_v18, %v5986_v37 }
  0xbd   : > { %5989 = vst [vmem:[#allocation7_spill] sm:$0xff] %v5213_v40 }
  0xc1   : > { %4308 = vmatmul.mubr.msk.bf16.gmra.mxu1 %vm533_vm2, %v1377_v62 }
  0xc2   : > { %4342 = vmatmul.mubr.msk.bf16.gmra.mxu0 %vm533_vm2, %v1780_v46  ;;  %4347 = vmatprep.mubr.msk.bf16.mxu1 %vm533_vm2, %v4878_v60  ;;  %v2434_v60 = vrot.slane %v5070_v15, 2 }
  0xc3   : > { %4381 = vmatprep.mubr.msk.bf16.mxu0 %vm533_vm2, %v2429_v6 }
  0xc4   : > { %v2435_v25 = vsel %vm2031_vm4, %v2432_v30, %v2434_v60  ;;  %v2437_v24 = vsel %vm2031_vm4, %v2434_v60, %v2436_v21 }
  0xc9   : > { %4348 = vmatmul.mubr.msk.bf16.vlgmr.msra.gmra.mxu1 %vm533_vm2, %v4873_v41  ;;  %v2438_v41 = vrot.slane %v5076_v27, 2 }
  0xca   : > { %4382 = vmatmul.mubr.msk.bf16.vlgmr.msra.gmra.mxu0 %vm533_vm2, %v2431_v53  ;;  %4414 = vmatpush3.bf16.msra.mxu1 %v2912_v58 }
  0xcb   : > { %4448 = vmatpush3.bf16.msra.mxu0 %v3196_v55  ;;  %4351 = vmatprep.mubr.msk.bf16.mxu1 %vm533_vm2, %v4888_v2  ;;  %v2440_v2 = vrot.slane %v5100_v56, 2  ;;  %v2439_v18 = vsel %vm2031_vm4, %v2436_v21, %v2438_v41 }
  0xcc   : > { %4385 = vmatprep.mubr.msk.bf16.mxu0 %vm533_vm2, %v2433_v47 }
  0xcd   : > { %v2441_v1 = vsel %vm2031_vm4, %v2438_v41, %v2440_v2  ;;  %v2456_v41 = vrot.slane %v5201_v31, 2 }
  0xd1   : > { %4352 = vmatmul.mubr.msk.bf16.gmra.mxu1 %vm533_vm2, %v4896_v8  ;;  %v2442_v8 = vrot.slane %v5104_v52, 2 }
  0xd2   : > { %4386 = vmatmul.mubr.msk.bf16.gmra.mxu0 %vm533_vm2, %v2435_v25  ;;  %4355 = vmatprep.mubr.msk.bf16.mxu1 %vm533_vm2, %v4899_v9  ;;  %v2444_v9 = vrot.slane %v5126_v7, 2  ;;  %v2454_v25 = vrot.slane %v5179_v0, 2 }
  0xd3   : > { %4389 = vmatprep.mubr.msk.bf16.mxu0 %vm533_vm2, %v2437_v24  ;;  %v2443_v20 = vsel %vm2031_vm4, %v2440_v2, %v2442_v8 }
  0xd4   : > { %v2445_v36 = vsel %vm2031_vm4, %v2442_v8, %v2444_v9  ;;  %v2720_v8 = vshrl.u32 %v5008_v42, 16 }
  0xd9   : > { %4356 = vmatmul.mubr.msk.bf16.gmra.mxu1 %vm533_vm2, %v4905_v11  ;;  %v2446_v11 = vrot.slane %v5130_v63, 2 }
  0xda   : > { %4390 = vmatmul.mubr.msk.bf16.gmra.mxu0 %vm533_vm2, %v2439_v18  ;;  %4359 = vmatprep.mubr.msk.bf16.mxu1 %vm533_vm2, %v4918_v17  ;;  %v2448_v17 = vrot.slane %v5152_v10, 2  ;;  %v2712_v18 = vshrl.u32 %v5184_v19, 16 }
  0xdb   : > { %4393 = vmatprep.mubr.msk.bf16.mxu0 %vm533_vm2, %v2441_v1  ;;  %v2447_v12 = vsel %vm2031_vm4, %v2444_v9, %v2446_v11  ;;  %v2715_v1 = vshll.u32 %v5184_v19, 16  ;;  %v2722_v19 = vrot.slane %v2720_v8, 2 }
  0xdc   : > { %v2449_v46 = vsel %vm2031_vm4, %v2446_v11, %v2448_v17  ;;  %v4570_v11 = vld [vmem:[#allocation2 + $0x90] ss:$0 sps:$4 sm:$0x33]  }
  0xe1   : > { %4360 = vmatmul.mubr.msk.bf16.gmra.mxu1 %vm533_vm2, %v4924_v22  ;;  %v2450_v22 = vrot.slane %v5156_v51, 2 }
  0xe2   : > { %4394 = vmatmul.mubr.msk.bf16.gmra.mxu0 %vm533_vm2, %v2443_v20  ;;  %4363 = vmatprep.mubr.msk.bf16.mxu1 %vm533_vm2, %v4927_v44 }
  0xe3   : > { %4397 = vmatprep.mubr.msk.bf16.mxu0 %vm533_vm2, %v2445_v36  ;;  %v2451_v58 = vsel %vm2031_vm4, %v2448_v17, %v2450_v22  ;;  %v2453_v47 = vsel %vm2031_vm4, %v2450_v22, %v2452_v26  ;;  %v2455_v36 = vsel %vm2031_vm4, %v2452_v26, %v2454_v25  ;;  %v2457_v17 = vsel %vm2031_vm4, %v2454_v25, %v2456_v41 }
  0xe4   : > { %v2717_v22 = vrot.slane %v2715_v1, 3  ;;  %v2458_v26 = vrot.slane %v4570_v11, 2  ;;  %v2729_v25 = vshrl.u32 %v5015_v3, 16 }
  0xe9   : > { %v5270_v6 = vpop.f32.mrf.mxu1  ;;  %4364 = vmatmul.mubr.msk.bf16.gmra.mxu1 %vm533_vm2, %v4932_v39 }
  0xea   : > { %v5267_v62 = vpop.f32.mrf.mxu0  ;;  %4398 = vmatmul.mubr.msk.bf16.gmra.mxu0 %vm533_vm2, %v2447_v12  ;;  %4367 = vmatprep.mubr.msk.bf16.mxu1 %vm533_vm2, %v4939_v38 }
  0xeb   : > { %4401 = vmatprep.mubr.msk.bf16.mxu0 %vm533_vm2, %v2449_v46  ;;  %v5281_v30 = vpop.f32.mrf.mxu1  ;;  %v2714_v46 = vrot.slane %v2712_v18, 2  ;;  %v2732_v18 = vshll.u32 %v5015_v3, 16 }
  0xec   : > { %v5276_v44 = vpop.f32.mrf.mxu0 }
  0xed   : > { %v5285_v55 = vpop.f32.mrf.mxu1  ;;  %v2718_v8 = vor.u32 %v2717_v22, %v2714_v46  ;;  %v2734_v40 = vrot.slane %v2732_v18, 3  ;;  %v2747_v18 = vshrl.u32 %v5070_v15, 16 }
  0xee   : > { %v5283_v53 = vpop.f32.mrf.mxu0 }
  0xef   : > { %v5291_v60 = vpop.f32.mrf.mxu1 }
  0xf0   : > { %v5288_v39 = vpop.f32.mrf.mxu0 }
  0xf1   : > { %v5296_v38 = vpop.f32.mrf.mxu1  ;;  %4368 = vmatmul.mubr.msk.bf16.gmra.mxu1 %vm533_vm2, %v4943_v34  ;;  %v2723_v34 = vshll.u32 %v5008_v42, 16 }
  0xf2   : > { %v5293_v21 = vpop.f32.mrf.mxu0  ;;  %4402 = vmatmul.mubr.msk.bf16.gmra.mxu0 %vm533_vm2, %v2451_v58  ;;  %4371 = vmatprep.mubr.msk.bf16.mxu1 %vm533_vm2, %v4963_v61 }
  0xf3   : > { %4405 = vmatprep.mubr.msk.bf16.mxu0 %vm533_vm2, %v2453_v47  ;;  %v5307_v2 = vpop.f32.mrf.mxu1  ;;  %v2725_v58 = vrot.slane %v2723_v34, 3 }
  0xf4   : > { %v5302_v24 = vpop.f32.mrf.mxu0  ;;  %5990 = vst [vmem:[#allocation8_spill] sm:$0xff] %v5307_v2 }
  0xf5   : > { %v5315_v20 = vpop.f32.mrf.mxu1  ;;  %v2726_v34 = vor.u32 %v2725_v58, %v2722_v19 }
  0xf6   : > { %v5313_v9 = vpop.f32.mrf.mxu0  ;;  %5991 = vst [vmem:[#allocation9_spill] sm:$0xff] %v5315_v20 }
  0xf7   : > { %v5321_v12 = vpop.f32.mrf.mxu1  ;;  %v2727_v46 = vsel %vm2710_vm7, %v2718_v8, %v2726_v34  ;;  %v2750_v8 = vshll.u32 %v5070_v15, 16 }
  0xf8   : > { %v5318_v61 = vpop.f32.mrf.mxu0  ;;  %5992 = vst [vmem:[#allocation10_spill] sm:$0xff] %v5321_v12 }
  0xf9   : > { %v5326_v42 = vpop.f32.mrf.mxu1  ;;  %4372 = vmatmul.mubr.msk.bf16.gmra.mxu1 %vm533_vm2, %v4967_v29  ;;  %v2741_v29 = vshll.u32 %v5208_v4, 16 }
  0xfa   : > { %v5323_v47 = vpop.f32.mrf.mxu0  ;;  %4406 = vmatmul.mubr.msk.bf16.gmra.mxu0 %vm533_vm2, %v2455_v36  ;;  %5993 = vst [vmem:[#allocation11_spill] sm:$0xff] %v5326_v42  ;;  %4375 = vmatprep.mubr.msk.bf16.mxu1 %vm533_vm2, %v4991_v33  ;;  %v2738_v36 = vshrl.u32 %v5208_v4, 16  ;;  %v2731_v42 = vrot.slane %v2729_v25, 2  ;;  %v3119_v25 = vrot.slane %v5208_v4, 3  ;;  %v6000_v4 = vrot.slane %v5015_v3, 3 }
  0xfb   : > { %4409 = vmatprep.mubr.msk.bf16.mxu0 %vm533_vm2, %v2457_v17  ;;  %v5337_v1 = vpop.f32.mrf.mxu1  ;;  %v2459_v17 = vsel %vm2031_vm4, %v2456_v41, %v2458_v26  ;;  %v2743_v19 = vrot.slane %v2741_v29, 3  ;;  %v2765_v3 = vshrl.u32 %v5076_v27, 16 }
  0xfc   : > { %v5331_v37 = vpop.f32.mrf.mxu0  ;;  %5994 = vst [vmem:[#allocation12_spill] sm:$0xff] %v5337_v1  ;;  %v2740_v22 = vrot.slane %v2738_v36, 2  ;;  %v2735_v26 = vor.u32 %v2734_v40, %v2731_v42  ;;  %v3120_v42 = vsel %vm3113_vm6, %v6000_v4, %v3119_v25  ;;  %v2774_v4 = vshrl.u32 %v5100_v56, 16 }
  0xfd   : > { %v5343_v11 = vpop.f32.mrf.mxu1 }
  0xfe   : > { %v5341_v14 = vpop.f32.mrf.mxu0  ;;  %5995 = vst [vmem:[#allocation13_spill] sm:$0xff] %v5343_v11  ;;  %v2744_v29 = vor.u32 %v2743_v19, %v2740_v22  ;;  %v2736_v40 = vsel %vm2710_vm7, %v2726_v34, %v2735_v26  ;;  %v2752_v11 = vrot.slane %v2750_v8, 3  ;;  %v2768_v34 = vshll.u32 %v5076_v27, 16 }
  0xff   : > { %v5348_v49 = vpop.f32.mrf.mxu1  ;;  %v6002_v27 = vrot.slane %v5070_v15, 3 }
 0x100   : > { %v5346_v33 = vpop.f32.mrf.mxu0  ;;  %5996 = vst [vmem:[#allocation14_spill] sm:$0xff] %v5348_v49  ;;  %v2745_v22 = vsel %vm2710_vm7, %v2735_v26, %v2744_v29  ;;  %v2770_v2 = vrot.slane %v2768_v34, 3  ;;  %v2783_v34 = vshrl.u32 %v5104_v52, 16 }
 0x101   : > { %v5354_v1 = vpop.f32.mrf.mxu1  ;;  %4376 = vmatmul.mubr.msk.bf16.gmra.mxu1 %vm533_vm2, %v4996_v59  ;;  %v2759_v59 = vshll.u32 %v5072_v16, 16 }
 0x102   : > { %v5351_v58 = vpop.f32.mrf.mxu0  ;;  %4410 = vmatmul.mubr.msk.bf16.gmra.mxu0 %vm533_vm2, %v2459_v17  ;;  %5997 = vst [vmem:[#allocation15_spill] sm:$0xff] %v5354_v1  ;;  %4415 = vmatprep.mubr.msk.bf16.mxu1 %vm533_vm2, %v2727_v46  ;;  %v2756_v17 = vshrl.u32 %v5072_v16, 16  ;;  %v2749_v46 = vrot.slane %v2747_v18, 2 }
 0x103   : > { %4449 = vmatprep.mubr.msk.bf16.mxu0 %vm533_vm2, %v5031_v23  ;;  %v5366_v36 = vpop.f32.mrf.mxu1  ;;  %v2761_v16 = vrot.slane %v2759_v59, 3 }
 0x104   : > { %v5360_v41 = vpop.f32.mrf.mxu0  ;;  %5998 = vst [vmem:[#allocation16_spill] sm:$0xff] %v5366_v36  ;;  %v2758_v19 = vrot.slane %v2756_v17, 2  ;;  %v2753_v26 = vor.u32 %v2752_v11, %v2749_v46 }
 0x105   : > { %v5372_v23 = vpop.f32.mrf.mxu1 }
 0x106   : > { %v5370_v1 = vpop.f32.mrf.mxu0  ;;  %5999 = vst [vmem:[#allocation17_spill] sm:$0xff] %v5372_v23  ;;  %v2762_v59 = vor.u32 %v2761_v16, %v2758_v19  ;;  %v2754_v19 = vsel %vm2710_vm7, %v2744_v29, %v2753_v26  ;;  %v2776_v16 = vrot.slane %v2774_v4, 2  ;;  %v2792_v4 = vshrl.u32 %v5126_v7, 16 }
 0x107   : > { %v5380_v36 = vpop.f32.mrf.mxu1 }
 0x108   : > { %v5374_v49 = vpop.f32.mrf.mxu0  ;;  %6001 = vst [vmem:[#allocation18_spill] sm:$0xff] %v5380_v36 }
 0x109   : > { %v4213_v23 = vpop.f32.mrf.mxu1  ;;  %4416 = vmatmul.mubr.msk.bf16.vlgmr.msra.gmra.mxu1 %vm533_vm2, %v2736_v40 }
 0x10a   : > { %v4247_v12 = vpop.f32.mrf.mxu0  ;;  %4450 = vmatmul.mubr.msk.bf16.vlgmr.msra.gmra.mxu0 %vm533_vm2, %v5045_v35  ;;  %v825_v18 = vadd.f32 %v4213_v23, %v5267_v62  ;;  %4419 = vmatprep.mubr.msk.bf16.mxu1 %vm533_vm2, %v2745_v22  ;;  %v2777_v35 = vshll.u32 %v5100_v56, 16  ;;  %v3122_v62 = vsel %vm3113_vm6, %v3119_v25, %v6002_v27  ;;  %v2767_v23 = vrot.slane %v2765_v3, 2 }
 0x10b   : > { %4453 = vmatprep.mubr.msk.bf16.mxu0 %vm533_vm2, %v3120_v42  ;;  %v816_v17 = vpop.f32.mrf.mxu1 }
 0x10c   : > { %v1068_v8 = vpop.f32.mrf.mxu0  ;;  %v5393_v36 = vadd.f32 %v4247_v12, %v825_v18  ;;  %v817_v40 = vadd.f32 %v816_v17, %v5276_v44  ;;  %v2763_v12 = vsel %vm2710_vm7, %v2753_v26, %v2762_v59  ;;  %v2779_v44 = vrot.slane %v2777_v35, 3 }
 0x10d   : > { %v4214_v20 = vpop.f32.mrf.mxu1  ;;  %v2795_v35 = vshll.u32 %v5126_v7, 16 }
 0x10e   : > { %v4248_v42 = vpop.f32.mrf.mxu0  ;;  %v5399_v22 = vadd.f32 %v1068_v8, %v817_v40  ;;  %v828_v11 = vadd.f32 %v4214_v20, %v5283_v53  ;;  %v2771_v53 = vor.u32 %v2770_v2, %v2767_v23  ;;  %v2780_v26 = vor.u32 %v2779_v44, %v2776_v16 }
 0x10f   : > { %v819_v56 = vpop.f32.mrf.mxu1  ;;  %v2797_v7 = vrot.slane %v2795_v35, 3  ;;  %v2804_v44 = vshll.u32 %v5130_v63, 16 }
 0x110   : > { %v1071_v46 = vpop.f32.mrf.mxu0  ;;  %v5404_v18 = vadd.f32 %v4248_v42, %v828_v11  ;;  %v820_v15 = vadd.f32 %v819_v56, %v5288_v39  ;;  %v2786_v39 = vshll.u32 %v5104_v52, 16  ;;  %v2785_v52 = vrot.slane %v2783_v34, 2 }
 0x111   : > { %v4217_v25 = vpop.f32.mrf.mxu1  ;;  %4420 = vmatmul.mubr.msk.bf16.gmra.mxu1 %vm533_vm2, %v2754_v19  ;;  %v2781_v19 = vsel %vm2710_vm7, %v2771_v53, %v2780_v26  ;;  %v2794_v56 = vrot.slane %v2792_v4, 2  ;;  %v2806_v4 = vrot.slane %v2804_v44, 3 }
 0x112   : > { %v4251_v17 = vpop.f32.mrf.mxu0  ;;  %4454 = vmatmul.mubr.msk.bf16.gmra.mxu0 %vm533_vm2, %v3122_v62  ;;  %v5411_v20 = vadd.f32 %v1071_v46, %v820_v15  ;;  %v841_v29 = vadd.f32 %v4217_v25, %v5293_v21  ;;  %4423 = vmatprep.mubr.msk.bf16.mxu1 %vm533_vm2, %v2763_v12  ;;  %v2772_v21 = vsel %vm2710_vm7, %v2762_v59, %v2771_v53  ;;  %v2788_v11 = vrot.slane %v2786_v39, 3 }
 0x113   : > { %4457 = vmatprep.mubr.msk.bf16.mxu0 %vm533_vm2, %v5087_v45  ;;  %v832_v8 = vpop.f32.mrf.mxu1 }
 0x114   : > { %v1084_v3 = vpop.f32.mrf.mxu0  ;;  %v5419_v40 = vadd.f32 %v4251_v17, %v841_v29  ;;  %v833_v45 = vadd.f32 %v832_v8, %v5302_v24  ;;  %v2810_v29 = vshrl.u32 %v5152_v10, 16 }
 0x115   : > { %v4218_v42 = vpop.f32.mrf.mxu1 }
 0x116   : > { %v4252_v2 = vpop.f32.mrf.mxu0  ;;  %v5423_v27 = vadd.f32 %v1084_v3, %v833_v45  ;;  %v844_v62 = vadd.f32 %v4218_v42, %v5313_v9  ;;  %v2801_v9 = vshrl.u32 %v5130_v63, 16  ;;  %v2813_v3 = vshll.u32 %v5152_v10, 16 }
 0x117   : > { %v835_v46 = vpop.f32.mrf.mxu1 }
 0x118   : > { %v1087_v23 = vpop.f32.mrf.mxu0  ;;  %v5427_v12 = vadd.f32 %v4252_v2, %v844_v62  ;;  %v836_v24 = vadd.f32 %v835_v46, %v5318_v61  ;;  %v2789_v61 = vor.u32 %v2788_v11, %v2785_v52  ;;  %v2803_v8 = vrot.slane %v2801_v9, 2 }
 0x119   : > { %v4221_v59 = vpop.f32.mrf.mxu1  ;;  %4424 = vmatmul.mubr.msk.bf16.gmra.mxu1 %vm533_vm2, %v2772_v21  ;;  %v2812_v62 = vrot.slane %v2810_v29, 2  ;;  %v2815_v10 = vrot.slane %v2813_v3, 3 }
 0x11a   : > { %v4255_v16 = vpop.f32.mrf.mxu0  ;;  %4458 = vmatmul.mubr.msk.bf16.gmra.mxu0 %vm533_vm2, %v5094_v54  ;;  %v5437_v15 = vadd.f32 %v1087_v23, %v836_v24  ;;  %v857_v17 = vadd.f32 %v4221_v59, %v5323_v47  ;;  %4427 = vmatprep.mubr.msk.bf16.mxu1 %vm533_vm2, %v2781_v19  ;;  %v2798_v54 = vor.u32 %v2797_v7, %v2794_v56  ;;  %v2822_v56 = vshll.u32 %v5156_v51, 16 }
 0x11b   : > { %4461 = vmatprep.mubr.msk.bf16.mxu0 %vm533_vm2, %v5113_v48  ;;  %v848_v53 = vpop.f32.mrf.mxu1  ;;  %v2790_v2 = vsel %vm2710_vm7, %v2780_v26, %v2789_v61  ;;  %v2828_v24 = vshrl.u32 %v5176_v50, 16 }
 0x11c   : > { %v1100_v25 = vpop.f32.mrf.mxu0  ;;  %v5443_v34 = vadd.f32 %v4255_v16, %v857_v17  ;;  %v849_v48 = vadd.f32 %v848_v53, %v5331_v37  ;;  %v2799_v21 = vsel %vm2710_vm7, %v2789_v61, %v2798_v54  ;;  %v2831_v16 = vshll.u32 %v5176_v50, 16 }
 0x11d   : > { %v4222_v63 = vpop.f32.mrf.mxu1  ;;  %v2824_v53 = vrot.slane %v2822_v56, 3 }
 0x11e   : > { %v4256_v39 = vpop.f32.mrf.mxu0  ;;  %v5446_v35 = vadd.f32 %v1100_v25, %v849_v48  ;;  %v860_v47 = vadd.f32 %v4222_v63, %v5341_v14  ;;  %v2807_v14 = vor.u32 %v2806_v4, %v2803_v8  ;;  %v2830_v48 = vrot.slane %v2828_v24, 2 }
 0x11f   : > { %v851_v42 = vpop.f32.mrf.mxu1  ;;  %v2833_v50 = vrot.slane %v2831_v16, 3  ;;  %v2840_v8 = vshll.u32 %v5179_v0, 16 }
 0x120   : > { %v1103_v45 = vpop.f32.mrf.mxu0  ;;  %v5451_v23 = vadd.f32 %v4256_v39, %v860_v47  ;;  %v852_v37 = vadd.f32 %v851_v42, %v5346_v33  ;;  %v2819_v33 = vshrl.u32 %v5156_v51, 16  ;;  %v2846_v42 = vshrl.u32 %v5201_v31, 16 }
 0x121   : > { %v4225_v11 = vpop.f32.mrf.mxu1  ;;  %4428 = vmatmul.mubr.msk.bf16.gmra.mxu1 %vm533_vm2, %v2790_v2 }
 0x122   : > { %v4259_v52 = vpop.f32.mrf.mxu0  ;;  %4462 = vmatmul.mubr.msk.bf16.gmra.mxu0 %vm533_vm2, %v5120_v43  ;;  %v5459_v26 = vadd.f32 %v1103_v45, %v852_v37  ;;  %v873_v46 = vadd.f32 %v4225_v11, %v5351_v58  ;;  %4431 = vmatprep.mubr.msk.bf16.mxu1 %vm533_vm2, %v2799_v21  ;;  %v2816_v43 = vor.u32 %v2815_v10, %v2812_v62  ;;  %v2821_v51 = vrot.slane %v2819_v33, 2 }
 0x123   : > { %4465 = vmatprep.mubr.msk.bf16.mxu0 %vm533_vm2, %v5139_v5  ;;  %v864_v7 = vpop.f32.mrf.mxu1  ;;  %v2808_v58 = vsel %vm2710_vm7, %v2798_v54, %v2807_v14  ;;  %v2849_v21 = vshll.u32 %v5201_v31, 16 }
 0x124   : > { %v1116_v19 = vpop.f32.mrf.mxu0  ;;  %v5467_v59 = vadd.f32 %v4259_v52, %v873_v46  ;;  %v865_v5 = vadd.f32 %v864_v7, %v5360_v41  ;;  %v2817_v3 = vsel %vm2710_vm7, %v2807_v14, %v2816_v43  ;;  %v2842_v52 = vrot.slane %v2840_v8, 3 }
 0x125   : > { %v4226_v44 = vpop.f32.mrf.mxu1  ;;  %v2848_v7 = vrot.slane %v2846_v42, 2  ;;  %v2851_v24 = vrot.slane %v2849_v21, 3  ;;  %v6006_v21 = vld [vmem:[#allocation6_spill] sm:$0xff] }
 0x126   : > { %v4260_v9 = vpop.f32.mrf.mxu0  ;;  %v5471_v17 = vadd.f32 %v1116_v19, %v865_v5  ;;  %v876_v25 = vadd.f32 %v4226_v44, %v5370_v1  ;;  %v2837_v1 = vshrl.u32 %v5179_v0, 16  ;;  %v4572_v19 = vld [vmem:[#allocation2 + $0x90] ss:$0 sps:$4 sm:$0x77]  }
 0x127   : > { %v867_v29 = vpop.f32.mrf.mxu1 }
 0x128   : > { %v1119_v61 = vpop.f32.mrf.mxu0  ;;  %v5475_v39 = vadd.f32 %v4260_v9, %v876_v25  ;;  %v868_v41 = vadd.f32 %v867_v29, %v5374_v49  ;;  %v2825_v49 = vor.u32 %v2824_v53, %v2821_v51  ;;  %v2839_v37 = vrot.slane %v2837_v1, 2 }
 0x129   : > { %v4229_v54 = vpop.f32.mrf.mxu1  ;;  %4432 = vmatmul.mubr.msk.bf16.gmra.mxu1 %vm533_vm2, %v2808_v58  ;;  %v2855_v25 = vshrl.u32 %v4572_v19, 16  ;;  %v2852_v51 = vor.u32 %v2851_v24, %v2848_v7 }
 0x12a   : > { %v4263_v63 = vpop.f32.mrf.mxu0  ;;  %4466 = vmatmul.mubr.msk.bf16.gmra.mxu0 %vm533_vm2, %v5146_v13  ;;  %v5485_v4 = vadd.f32 %v1119_v61, %v868_v41  ;;  %v889_v47 = vadd.f32 %v4229_v54, %v5270_v6  ;;  %4435 = vmatprep.mubr.msk.bf16.mxu1 %vm533_vm2, %v2817_v3  ;;  %v2834_v13 = vor.u32 %v2833_v50, %v2830_v48  ;;  %v6004_v41 = vld [vmem:[#allocation9_spill] sm:$0xff] }
 0x12b   : > { %4469 = vmatprep.mubr.msk.bf16.mxu0 %vm533_vm2, %v5164_v57  ;;  %v880_v2 = vpop.f32.mrf.mxu1  ;;  %v2826_v46 = vsel %vm2710_vm7, %v2816_v43, %v2825_v49  ;;  %v2857_v54 = vrot.slane %v2855_v25, 2 }
 0x12c   : > { %v1132_v45 = vpop.f32.mrf.mxu0  ;;  %v5491_v62 = vadd.f32 %v4263_v63, %v889_v47  ;;  %v881_v57 = vadd.f32 %v880_v2, %v5281_v30  ;;  %v2835_v56 = vsel %vm2710_vm7, %v2825_v49, %v2834_v13  ;;  %v6005_v49 = vld [vmem:[#allocation10_spill] sm:$0xff] }
 0x12d   : > { %v4230_v0 = vpop.f32.mrf.mxu1 }
 0x12e   : > { %v4264_v10 = vpop.f32.mrf.mxu0  ;;  %v5494_v11 = vadd.f32 %v1132_v45, %v881_v57  ;;  %v892_v6 = vadd.f32 %v4230_v0, %v5285_v55  ;;  %v2843_v55 = vor.u32 %v2842_v52, %v2839_v37  ;;  %v6008_v37 = vld [vmem:[#allocation11_spill] sm:$0xff] }
 0x12f   : > { %v883_v33 = vpop.f32.mrf.mxu1 }
 0x130   : > { %v1135_v14 = vpop.f32.mrf.mxu0  ;;  %v5499_v16 = vadd.f32 %v4264_v10, %v892_v6  ;;  %v884_v30 = vadd.f32 %v883_v33, %v5291_v60  ;;  %v2858_v60 = vshll.u32 %v4572_v19, 16  ;;  %v2853_v47 = vsel %vm2710_vm7, %v2843_v55, %v2852_v51 }
 0x131   : > { %v4233_v9 = vpop.f32.mrf.mxu1  ;;  %4436 = vmatmul.mubr.msk.bf16.gmra.mxu1 %vm533_vm2, %v2826_v46  ;;  %v3145_v10 = vrot.slane %v4572_v19, 3 }
 0x132   : > { %v4267_v5 = vpop.f32.mrf.mxu0  ;;  %4470 = vmatmul.mubr.msk.bf16.gmra.mxu0 %vm533_vm2, %v5171_v28  ;;  %v5507_v43 = vadd.f32 %v1135_v14, %v884_v30  ;;  %v905_v44 = vadd.f32 %v4233_v9, %v5296_v38  ;;  %4439 = vmatprep.mubr.msk.bf16.mxu1 %vm533_vm2, %v2835_v56  ;;  %v6003_v28 = vld [vmem:[#allocation8_spill] sm:$0xff]  ;;  %v2860_v1 = vrot.slane %v2858_v60, 3 }
 0x133   : > { %4473 = vmatprep.mubr.msk.bf16.mxu0 %vm533_vm2, %v5191_v32  ;;  %v896_v61 = vpop.f32.mrf.mxu1  ;;  %v2844_v32 = vsel %vm2710_vm7, %v2834_v13, %v2843_v55  ;;  %v6007_v13 = vld [vmem:[#allocation7_spill] sm:$0xff]  ;;  %v6009_v56 = vld [vmem:[#allocation12_spill] sm:$0xff]  ;;  %v6011_v55 = vld [vmem:[#allocation13_spill] sm:$0xff] }
 0x134   : > { %v1148_v58 = vpop.f32.mrf.mxu0  ;;  %v5511_v53 = vadd.f32 %v4267_v5, %v905_v44  ;;  %v897_v29 = vadd.f32 %v896_v61, %v6003_v28  ;;  %v2861_v14 = vor.u32 %v2860_v1, %v2857_v54  ;;  %v6010_v5 = vrot.slane %v5201_v31, 3  ;;  %v6012_v28 = vld [vmem:[#allocation14_spill] sm:$0xff] }
 0x135   : > { %v4234_v48 = vpop.f32.mrf.mxu1 }
 0x136   : > { %v4268_v3 = vpop.f32.mrf.mxu0  ;;  %v5515_v50 = vadd.f32 %v1148_v58, %v897_v29  ;;  %v908_v63 = vadd.f32 %v4234_v48, %v6004_v41  ;;  %v3146_v9 = vsel %vm3113_vm6, %v6010_v5, %v3145_v10  ;;  %v2862_v25 = vsel %vm2710_vm7, %v2852_v51, %v2861_v14  ;;  %v6014_v51 = vld [vmem:[#allocation16_spill] sm:$0xff]  ;;  %v6016_v10 = vld [vmem:[#allocation18_spill] sm:$0xff] }
 0x137   : > { %v899_v8 = vpop.f32.mrf.mxu1 }
 0x138   : > { %v1151_v38 = vpop.f32.mrf.mxu0  ;;  %v5519_v45 = vadd.f32 %v4268_v3, %v908_v63  ;;  %v900_v2 = vadd.f32 %v899_v8, %v6005_v49 }
 0x139   : > { %v4237_v57 = vpop.f32.mrf.mxu1  ;;  %4440 = vmatmul.mubr.msk.bf16.gmra.mxu1 %vm533_vm2, %v2844_v32  ;;  %v6013_v32 = vld [vmem:[#allocation15_spill] sm:$0xff] }
 0x13a   : > { %v4271_v42 = vpop.f32.mrf.mxu0  ;;  %4474 = vmatmul.mubr.msk.bf16.gmra.mxu0 %vm533_vm2, %v6006_v21  ;;  %v5527_v0 = vadd.f32 %v1151_v38, %v900_v2  ;;  %v921_v52 = vadd.f32 %v4237_v57, %v6008_v37  ;;  %4443 = vmatprep.mubr.msk.bf16.mxu1 %vm533_vm2, %v2853_v47  ;;  %v6015_v2 = vld [vmem:[#allocation17_spill] sm:$0xff] }
 0x13b   : > { %4477 = vmatprep.mubr.msk.bf16.mxu0 %vm533_vm2, %v6007_v13  ;;  %v912_v46 = vpop.f32.mrf.mxu1 }
 0x13c   : > { %v1164_v6 = vpop.f32.mrf.mxu0  ;;  %v5531_v33 = vadd.f32 %v4271_v42, %v921_v52  ;;  %v913_v7 = vadd.f32 %v912_v46, %v6009_v56 }
 0x13d   : > { %v4238_v30 = vpop.f32.mrf.mxu1 }
 0x13e   : > { %v4272_v24 = vpop.f32.mrf.mxu0  ;;  %v5537_v19 = vadd.f32 %v1164_v6, %v913_v7  ;;  %v924_v44 = vadd.f32 %v4238_v30, %v6011_v55 }
 0x13f   : > { %v915_v60 = vpop.f32.mrf.mxu1 }
 0x140   : > { %v1167_v58 = vpop.f32.mrf.mxu0  ;;  %v5541_v61 = vadd.f32 %v4272_v24, %v924_v44  ;;  %v916_v29 = vadd.f32 %v915_v60, %v6012_v28 }
 0x141   : > { %v4241_v48 = vpop.f32.mrf.mxu1  ;;  %4444 = vmatmul.mubr.msk.bf16.gmra.mxu1 %vm533_vm2, %v2862_v25 }
 0x142   : > { %v4275_v3 = vpop.f32.mrf.mxu0  ;;  %4478 = vmatmul.mubr.msk.bf16.gmra.mxu0 %vm533_vm2, %v3146_v9  ;;  %v5546_v31 = vadd.f32 %v1167_v58, %v916_v29  ;;  %v937_v41 = vadd.f32 %v4241_v48, %v6013_v32 }
 0x143   : > { %v928_v38 = vpop.f32.mrf.mxu1 }
 0x144   : > { %v1180_v63 = vpop.f32.mrf.mxu0  ;;  %v5549_v54 = vadd.f32 %v4275_v3, %v937_v41  ;;  %v929_v1 = vadd.f32 %v928_v38, %v6014_v51 }
 0x145   : > { %v4242_v47 = vpop.f32.mrf.mxu1 }
 0x146   : > { %v4276_v8 = vpop.f32.mrf.mxu0  ;;  %v5552_v49 = vadd.f32 %v1180_v63, %v929_v1  ;;  %v940_v42 = vadd.f32 %v4242_v47, %v6015_v2 }
 0x147   : > { %v931_v57 = vpop.f32.mrf.mxu1 }
 0x148   : > { %v1183_v21 = vpop.f32.mrf.mxu0  ;;  %v5555_v13 = vadd.f32 %v4276_v8, %v940_v42  ;;  %v932_v37 = vadd.f32 %v931_v57, %v6016_v10 }
 0x149   : > { %v4281_v6 = vpop.f32.mrf.mxu1 }
 0x14a   : > { %v4315_v52 = vpop.f32.mrf.mxu0  ;;  %v5558_v14 = vadd.f32 %v1183_v21, %v932_v37  ;;  %v1592_v46 = vadd.f32 %v4281_v6, %v5393_v36 }
 0x14b   : > { %v1463_v7 = vpop.f32.mrf.mxu1 }
 0x14c   : > { %v1866_v56 = vpop.f32.mrf.mxu0  ;;  %v5561_v24 = vadd.f32 %v4315_v52, %v1592_v46  ;;  %v1590_v30 = vadd.f32 %v1463_v7, %v5399_v22 }
 0x14d   : > { %v4282_v9 = vpop.f32.mrf.mxu1 }
 0x14e   : > { %v4316_v5 = vpop.f32.mrf.mxu0  ;;  %v5564_v55 = vadd.f32 %v1866_v56, %v1590_v30  ;;  %v1593_v44 = vadd.f32 %v4282_v9, %v5404_v18 }
 0x14f   : > { %v1466_v25 = vpop.f32.mrf.mxu1 }
 0x150   : > { %v1869_v58 = vpop.f32.mrf.mxu0  ;;  %v5567_v60 = vadd.f32 %v4316_v5, %v1593_v44  ;;  %v1591_v28 = vadd.f32 %v1466_v25, %v5411_v20 }
 0x151   : > { %v4285_v36 = vpop.f32.mrf.mxu1 }
 0x152   : > { %v4319_v29 = vpop.f32.mrf.mxu0  ;;  %v5570_v3 = vadd.f32 %v1869_v58, %v1591_v28  ;;  %v1596_v48 = vadd.f32 %v4285_v36, %v5419_v40 }
 0x153   : > { %v1479_v22 = vpop.f32.mrf.mxu1 }
 0x154   : > { %v1882_v32 = vpop.f32.mrf.mxu0  ;;  %v5573_v41 = vadd.f32 %v4319_v29, %v1596_v48  ;;  %v1594_v63 = vadd.f32 %v1479_v22, %v5423_v27 }
 0x155   : > { %v4286_v18 = vpop.f32.mrf.mxu1 }
 0x156   : > { %v4320_v38 = vpop.f32.mrf.mxu0  ;;  %v5576_v51 = vadd.f32 %v1882_v32, %v1594_v63  ;;  %v1597_v1 = vadd.f32 %v4286_v18, %v5427_v12 }
 0x157   : > { %v1482_v20 = vpop.f32.mrf.mxu1 }
 0x158   : > { %v1885_v8 = vpop.f32.mrf.mxu0  ;;  %v5579_v47 = vadd.f32 %v4320_v38, %v1597_v1  ;;  %v1595_v2 = vadd.f32 %v1482_v20, %v5437_v15 }
 0x159   : > { %v4289_v40 = vpop.f32.mrf.mxu1 }
 0x15a   : > { %v4323_v42 = vpop.f32.mrf.mxu0  ;;  %v5582_v21 = vadd.f32 %v1885_v8, %v1595_v2  ;;  %v1600_v57 = vadd.f32 %v4289_v40, %v5443_v34 }
 0x15b   : > { %v1495_v27 = vpop.f32.mrf.mxu1 }
 0x15c   : > { %v1898_v10 = vpop.f32.mrf.mxu0  ;;  %v5585_v37 = vadd.f32 %v4323_v42, %v1600_v57  ;;  %v1598_v52 = vadd.f32 %v1495_v27, %v5446_v35 }
 0x15d   : > { %v4290_v12 = vpop.f32.mrf.mxu1 }
 0x15e   : > { %v4324_v6 = vpop.f32.mrf.mxu0  ;;  %v5588_v46 = vadd.f32 %v1898_v10, %v1598_v52  ;;  %v1601_v56 = vadd.f32 %v4290_v12, %v5451_v23 }
 0x15f   : > { %v1498_v15 = vpop.f32.mrf.mxu1 }
 0x160   : > { %v1901_v7 = vpop.f32.mrf.mxu0  ;;  %v5591_v30 = vadd.f32 %v4324_v6, %v1601_v56  ;;  %v1599_v5 = vadd.f32 %v1498_v15, %v5459_v26 }
 0x161   : > { %v4293_v34 = vpop.f32.mrf.mxu1 }
 0x162   : > { %v4327_v9 = vpop.f32.mrf.mxu0  ;;  %v5594_v44 = vadd.f32 %v1901_v7, %v1599_v5  ;;  %v1604_v58 = vadd.f32 %v4293_v34, %v5467_v59 }
 0x163   : > { %v1511_v35 = vpop.f32.mrf.mxu1 }
 0x164   : > { %v1914_v25 = vpop.f32.mrf.mxu0  ;;  %v5597_v28 = vadd.f32 %v4327_v9, %v1604_v58  ;;  %v1602_v29 = vadd.f32 %v1511_v35, %v5471_v17 }
 0x165   : > { %v4294_v23 = vpop.f32.mrf.mxu1 }
 0x166   : > { %v4328_v36 = vpop.f32.mrf.mxu0  ;;  %v5600_v48 = vadd.f32 %v1914_v25, %v1602_v29  ;;  %v1605_v32 = vadd.f32 %v4294_v23, %v5475_v39 }
 0x167   : > { %v1514_v26 = vpop.f32.mrf.mxu1 }
 0x168   : > { %v1917_v22 = vpop.f32.mrf.mxu0  ;;  %v5603_v63 = vadd.f32 %v4328_v36, %v1605_v32  ;;  %v1603_v38 = vadd.f32 %v1514_v26, %v5485_v4 }
 0x169   : > { %v4297_v59 = vpop.f32.mrf.mxu1 }
 0x16a   : > { %v4331_v18 = vpop.f32.mrf.mxu0  ;;  %v5606_v1 = vadd.f32 %v1917_v22, %v1603_v38  ;;  %v1608_v8 = vadd.f32 %v4297_v59, %v5491_v62 }
 0x16b   : > { %v1527_v17 = vpop.f32.mrf.mxu1 }
 0x16c   : > { %v1930_v20 = vpop.f32.mrf.mxu0  ;;  %v5609_v2 = vadd.f32 %v4331_v18, %v1608_v8  ;;  %v1606_v42 = vadd.f32 %v1527_v17, %v5494_v11 }
 0x16d   : > { %v4298_v39 = vpop.f32.mrf.mxu1 }
 0x16e   : > { %v4332_v40 = vpop.f32.mrf.mxu0  ;;  %v5612_v57 = vadd.f32 %v1930_v20, %v1606_v42  ;;  %v1609_v10 = vadd.f32 %v4298_v39, %v5499_v16 }
 0x16f   : > { %v1530_v4 = vpop.f32.mrf.mxu1 }
 0x170   : > { %v1933_v27 = vpop.f32.mrf.mxu0  ;;  %v5615_v52 = vadd.f32 %v4332_v40, %v1609_v10  ;;  %v1607_v6 = vadd.f32 %v1530_v4, %v5507_v43 }
 0x171   : > { %v4301_v62 = vpop.f32.mrf.mxu1 }
 0x172   : > { %6017 = vst [vmem:[#allocation8_spill] sm:$0xff] %v5615_v52  ;;  %v4335_v12 = vpop.f32.mrf.mxu0  ;;  %v5618_v56 = vadd.f32 %v1933_v27, %v1607_v6  ;;  %v1612_v7 = vadd.f32 %v4301_v62, %v5511_v53 }
 0x173   : > { %v1543_v11 = vpop.f32.mrf.mxu1 }
 0x174   : > { %6018 = vst [vmem:[#allocation9_spill] sm:$0xff] %v5618_v56  ;;  %v1946_v15 = vpop.f32.mrf.mxu0  ;;  %v5621_v5 = vadd.f32 %v4335_v12, %v1612_v7  ;;  %v1610_v9 = vadd.f32 %v1543_v11, %v5515_v50 }
 0x175   : > { %v4302_v16 = vpop.f32.mrf.mxu1 }
 0x176   : > { %6019 = vst [vmem:[#allocation10_spill] sm:$0xff] %v5621_v5  ;;  %v4336_v34 = vpop.f32.mrf.mxu0  ;;  %v5624_v58 = vadd.f32 %v1946_v15, %v1610_v9  ;;  %v1613_v25 = vadd.f32 %v4302_v16, %v5519_v45 }
 0x177   : > { %v1546_v43 = vpop.f32.mrf.mxu1 }
 0x178   : > { %6020 = vst [vmem:[#allocation6_spill] sm:$0xff] %v5624_v58  ;;  %v1949_v35 = vpop.f32.mrf.mxu0  ;;  %v5627_v29 = vadd.f32 %v4336_v34, %v1613_v25  ;;  %v1611_v36 = vadd.f32 %v1546_v43, %v5527_v0 }
 0x179   : > { %v4305_v53 = vpop.f32.mrf.mxu1 }
 0x17a   : > { %6021 = vst [vmem:[#allocation7_spill] sm:$0xff] %v5627_v29  ;;  %v4339_v23 = vpop.f32.mrf.mxu0  ;;  %v5630_v32 = vadd.f32 %v1949_v35, %v1611_v36  ;;  %v1616_v22 = vadd.f32 %v4305_v53, %v5531_v33 }
 0x17b   : > { %v1559_v50 = vpop.f32.mrf.mxu1 }
 0x17c   : > { %6022 = vst [vmem:[#allocation11_spill] sm:$0xff] %v5630_v32  ;;  %v1962_v26 = vpop.f32.mrf.mxu0  ;;  %v5633_v38 = vadd.f32 %v4339_v23, %v1616_v22  ;;  %v1614_v18 = vadd.f32 %v1559_v50, %v5537_v19 }
 0x17d   : > { %v4306_v45 = vpop.f32.mrf.mxu1 }
 0x17e   : > { %6023 = vst [vmem:[#allocation12_spill] sm:$0xff] %v5633_v38  ;;  %v4340_v59 = vpop.f32.mrf.mxu0  ;;  %v5636_v8 = vadd.f32 %v1962_v26, %v1614_v18  ;;  %v1617_v20 = vadd.f32 %v4306_v45, %v5541_v61 }
 0x17f   : > { %v1562_v0 = vpop.f32.mrf.mxu1 }
 0x180   : > { %6024 = vst [vmem:[#allocation13_spill] sm:$0xff] %v5636_v8  ;;  %v1965_v17 = vpop.f32.mrf.mxu0  ;;  %v5639_v42 = vadd.f32 %v4340_v59, %v1617_v20  ;;  %v1615_v40 = vadd.f32 %v1562_v0, %v5546_v31 }
 0x181   : > { %v4309_v33 = vpop.f32.mrf.mxu1 }
 0x182   : > { %6025 = vst [vmem:[#allocation14_spill] sm:$0xff] %v5639_v42  ;;  %v4343_v39 = vpop.f32.mrf.mxu0  ;;  %v5642_v10 = vadd.f32 %v1965_v17, %v1615_v40  ;;  %v1620_v27 = vadd.f32 %v4309_v33, %v5549_v54 }
 0x183   : > { %v1575_v19 = vpop.f32.mrf.mxu1 }
 0x184   : > { %6026 = vst [vmem:[#allocation15_spill] sm:$0xff] %v5642_v10  ;;  %v1978_v4 = vpop.f32.mrf.mxu0  ;;  %v5645_v6 = vadd.f32 %v4343_v39, %v1620_v27  ;;  %v1618_v12 = vadd.f32 %v1575_v19, %v5552_v49 }
 0x185   : > { %v4310_v61 = vpop.f32.mrf.mxu1 }
 0x186   : > { %6027 = vst [vmem:[#allocation16_spill] sm:$0xff] %v5645_v6  ;;  %v4344_v62 = vpop.f32.mrf.mxu0  ;;  %v5648_v7 = vadd.f32 %v1978_v4, %v1618_v12  ;;  %v1621_v15 = vadd.f32 %v4310_v61, %v5555_v13 }
 0x187   : > { %v1578_v31 = vpop.f32.mrf.mxu1 }
 0x188   : > { %6028 = vst [vmem:[#allocation17_spill] sm:$0xff] %v5648_v7  ;;  %v1981_v11 = vpop.f32.mrf.mxu0  ;;  %v5651_v9 = vadd.f32 %v4344_v62, %v1621_v15  ;;  %v1619_v34 = vadd.f32 %v1578_v31, %v5558_v14 }
 0x189   : > { %v4349_v54 = vpop.f32.mrf.mxu1 }
 0x18a   : > { %6029 = vst [vmem:[#allocation18_spill] sm:$0xff] %v5651_v9  ;;  %v5654_v16 = vpop.f32.mrf.mxu0  ;;  %v5656_v25 = vadd.f32 %v1981_v11, %v1619_v34 }
 0x18b   : > { %v2150_v49 = vpop.f32.mrf.mxu1 }
 0x18c   : > { %6030 = vst [vmem:[#allocation19_spill] sm:$0xff] %v5656_v25  ;;  %v5658_v35 = vpop.f32.mrf.mxu0 }
 0x18d   : > { %v4350_v36 = vpop.f32.mrf.mxu1 }
 0x18e   : > { %v5660_v43 = vpop.f32.mrf.mxu0 }
 0x18f   : > { %v5664_v13 = vpop.f32.mrf.mxu1 }
 0x190   : > { %v5662_v23 = vpop.f32.mrf.mxu0 }
 0x191   : > { %v5668_v22 = vpop.f32.mrf.mxu1 }
 0x192   : > { %v5666_v53 = vpop.f32.mrf.mxu0 }
 0x193   : > { %v5672_v26 = vpop.f32.mrf.mxu1 }
 0x194   : > { %v5670_v14 = vpop.f32.mrf.mxu0 }
 0x195   : > { %v5676_v18 = vpop.f32.mrf.mxu1 }
 0x196   : > { %v5674_v50 = vpop.f32.mrf.mxu0 }
 0x197   : > { %v5680_v45 = vpop.f32.mrf.mxu1 }
 0x198   : > { %v5678_v59 = vpop.f32.mrf.mxu0 }
 0x199   : > { %v5684_v17 = vpop.f32.mrf.mxu1 }
 0x19a   : > { %v5682_v20 = vpop.f32.mrf.mxu0 }
 0x19b   : > { %v5688_v40 = vpop.f32.mrf.mxu1 }
 0x19c   : > { %v5686_v0 = vpop.f32.mrf.mxu0 }
 0x19d   : > { %v5692_v33 = vpop.f32.mrf.mxu1 }
 0x19e   : > { %v5690_v39 = vpop.f32.mrf.mxu0 }
 0x19f   : > { %v5696_v4 = vpop.f32.mrf.mxu1 }
 0x1a0   : > { %v5694_v27 = vpop.f32.mrf.mxu0 }
 0x1a1   : > { %v5700_v12 = vpop.f32.mrf.mxu1 }
 0x1a2   : > { %v5698_v19 = vpop.f32.mrf.mxu0 }
 0x1a3   : > { %v5704_v61 = vpop.f32.mrf.mxu1 }
 0x1a4   : > { %v5702_v62 = vpop.f32.mrf.mxu0 }
 0x1a5   : > { %v5708_v11 = vpop.f32.mrf.mxu1 }
 0x1a6   : > { %v5706_v15 = vpop.f32.mrf.mxu0 }
 0x1a7   : > { %v5712_v34 = vpop.f32.mrf.mxu1 }
 0x1a8   : > { %v5710_v31 = vpop.f32.mrf.mxu0 }
 0x1a9   : > { %v5716_v9 = vpop.f32.mrf.mxu1 }
 0x1aa   : > { %v5714_v25 = vpop.f32.mrf.mxu0 }
 0x1ab   : > { %v5720_v6 = vpop.f32.mrf.mxu1 }
 0x1ac   : > { %v5718_v7 = vpop.f32.mrf.mxu0 }
 0x1ad   : > { %6031 = vst [vmem:[#allocation20_spill] sm:$0xff] %v5718_v7  ;;  %v5724_v42 = vpop.f32.mrf.mxu1 }
 0x1ae   : > { %v5722_v10 = vpop.f32.mrf.mxu0  ;;  %6033 = vst [vmem:[#allocation22_spill] sm:$0xff] %v5724_v42 }
 0x1af   : > { %6032 = vst [vmem:[#allocation21_spill] sm:$0xff] %v5722_v10  ;;  %v5728_v38 = vpop.f32.mrf.mxu1 }
 0x1b0   : > { %v5726_v8 = vpop.f32.mrf.mxu0  ;;  %6035 = vst [vmem:[#allocation24_spill] sm:$0xff] %v5728_v38 }
 0x1b1   : > { %6034 = vst [vmem:[#allocation23_spill] sm:$0xff] %v5726_v8  ;;  %v5732_v29 = vpop.f32.mrf.mxu1 }
 0x1b2   : > { %v5730_v32 = vpop.f32.mrf.mxu0  ;;  %6037 = vst [vmem:[#allocation26_spill] sm:$0xff] %v5732_v29 }
 0x1b3   : > { %6036 = vst [vmem:[#allocation25_spill] sm:$0xff] %v5730_v32  ;;  %v5736_v5 = vpop.f32.mrf.mxu1 }
 0x1b4   : > { %v5734_v58 = vpop.f32.mrf.mxu0  ;;  %6039 = vst [vmem:[#allocation28_spill] sm:$0xff] %v5736_v5 }
 0x1b5   : > { %6038 = vst [vmem:[#allocation27_spill] sm:$0xff] %v5734_v58  ;;  %v5740_v7 = vpop.f32.mrf.mxu1 }
 0x1b6   : > { %v5738_v56 = vpop.f32.mrf.mxu0  ;;  %6041 = vst [vmem:[#allocation30_spill] sm:$0xff] %v5740_v7 }
 0x1b7   : > { %6040 = vst [vmem:[#allocation29_spill] sm:$0xff] %v5738_v56  ;;  %v5744_v10 = vpop.f32.mrf.mxu1 }
 0x1b8   : > { %v5742_v52 = vpop.f32.mrf.mxu0  ;;  %6043 = vst [vmem:[#allocation32_spill] sm:$0xff] %v5744_v10 }
 0x1b9   : > { %6042 = vst [vmem:[#allocation31_spill] sm:$0xff] %v5742_v52  ;;  %v5748_v8 = vpop.f32.mrf.mxu1 }
 0x1ba   : > { %v5746_v42 = vpop.f32.mrf.mxu0  ;;  %6045 = vst [vmem:[#allocation34_spill] sm:$0xff] %v5748_v8 }
 0x1bb   : > { %6044 = vst [vmem:[#allocation33_spill] sm:$0xff] %v5746_v42  ;;  %v5752_v32 = vpop.f32.mrf.mxu1 }
 0x1bc   : > { %v5750_v38 = vpop.f32.mrf.mxu0  ;;  %6047 = vst [vmem:[#allocation36_spill] sm:$0xff] %v5752_v32 }
 0x1bd   : > { %6046 = vst [vmem:[#allocation35_spill] sm:$0xff] %v5750_v38  ;;  %v5756_v58 = vpop.f32.mrf.mxu1  ;;  %v2279_v38 = vadd.f32 %v4349_v54, %v5561_v24  ;;  %v2278_v24 = vadd.f32 %v5664_v13, %v5570_v3 }
 0x1be   : > { %v5754_v29 = vpop.f32.mrf.mxu0  ;;  %6049 = vst [vmem:[#allocation38_spill] sm:$0xff] %v5756_v58 }
 0x1bf   : > { %6048 = vst [vmem:[#allocation37_spill] sm:$0xff] %v5754_v29  ;;  %v5760_v56 = vpop.f32.mrf.mxu1  ;;  %v2277_v29 = vadd.f32 %v2150_v49, %v5564_v55  ;;  %v5788_v55 = vld [vmem:[%s5983_s2] ss:$0 sm:$0xff] }
 0x1c0   : > { %v5758_v5 = vpop.f32.mrf.mxu0  ;;  %6051 = vst [vmem:[#allocation40_spill] sm:$0xff] %v5760_v56 }
 0x1c1   : > { %6050 = vst [vmem:[#allocation39_spill] sm:$0xff] %v5758_v5  ;;  %v5764_v52 = vpop.f32.mrf.mxu1 }
 0x1c2   : > { %v5762_v7 = vpop.f32.mrf.mxu0  ;;  %6053 = vst [vmem:[#allocation42_spill] sm:$0xff] %v5764_v52  ;;  %v2280_v52 = vadd.f32 %v4350_v36, %v5567_v60  ;;  %v2283_v36 = vadd.f32 %v5668_v22, %v5573_v41 }
 0x1c3   : > { %6052 = vst [vmem:[#allocation41_spill] sm:$0xff] %v5762_v7  ;;  %v5768_v42 = vpop.f32.mrf.mxu1  ;;  %v2674_v7 = vadd.f32 %v5654_v16, %v2279_v38 }
 0x1c4   : > { %v5766_v10 = vpop.f32.mrf.mxu0  ;;  %6055 = vst [vmem:[#allocation44_spill] sm:$0xff] %v5768_v42  ;;  %v2672_v42 = vadd.f32 %v5658_v35, %v2277_v29  ;;  %v2281_v29 = vadd.f32 %v5672_v26, %v5576_v51  ;;  %v2678_v51 = vadd.f32 %v5666_v53, %v2283_v36 }
 0x1c5   : > { %6054 = vst [vmem:[#allocation43_spill] sm:$0xff] %v5766_v10  ;;  %v5773_v32 = vpop.f32.mrf.mxu1 }
 0x1c6   : > { %v5771_v8 = vpop.f32.mrf.mxu0 }
 0x1c7   : > { %6056 = vst [vmem:[#allocation45_spill] sm:$0xff] %v5771_v8  ;;  %v5778_v5 = vpop.f32.mrf.mxu1 }
 0x1c8   : > { %v5776_v58 = vpop.f32.mrf.mxu0  ;;  %6058 = vst [vmem:[#allocation47_spill] sm:$0xff] %v5778_v5 }
 0x1c9   : > { %6057 = vst [vmem:[#allocation46_spill] sm:$0xff] %v5776_v58  ;;  %v4417_v10 = vpop.f32.mrf.mxu1  ;;  %v2675_v58 = vadd.f32 %v5660_v43, %v2280_v52  ;;  %v2284_v52 = vadd.f32 %v5676_v18, %v5579_v47 }
 0x1ca   : > { %v4451_v56 = vpop.f32.mrf.mxu0  ;;  %v3077_v54 = vadd.f32 %v4417_v10, %v2674_v7  ;;  %v2673_v10 = vadd.f32 %v5662_v23, %v2278_v24  ;;  %v2676_v23 = vadd.f32 %v5670_v14, %v2281_v29 }
 0x1cb   : > { %v2948_v49 = vpop.f32.mrf.mxu1 }
 0x1cc   : > { %v3232_v8 = vpop.f32.mrf.mxu0  ;;  %v3361_v38 = vadd.f32 %v4451_v56, %v3077_v54  ;;  %v3075_v16 = vadd.f32 %v2948_v49, %v2672_v42 }
 0x1cd   : > { %v4418_v3 = vpop.f32.mrf.mxu1 }
 0x1ce   : > { %v4452_v60 = vpop.f32.mrf.mxu0  ;;  %v3400_v7 = vadd.f32 %v5788_v55, %v3361_v38  ;;  %v3359_v35 = vadd.f32 %v3232_v8, %v3075_v16  ;;  %v3078_v13 = vadd.f32 %v4418_v3, %v2675_v58  ;;  %v2282_v8 = vadd.f32 %v5680_v45, %v5582_v21 }
 0x1cf   : > { %v2951_v56 = vpop.f32.mrf.mxu1  ;;  %v2679_v38 = vadd.f32 %v5674_v50, %v2284_v52  ;;  %v2287_v16 = vadd.f32 %v5684_v17, %v5585_v37  ;;  %v2285_v52 = vadd.f32 %v5688_v40, %v5588_v46 }
 0x1d0   : > { %v3235_v5 = vpop.f32.mrf.mxu0  ;;  %v3432_v42 = vmax.f32 %v3400_v7, 0.0  ;;  %v3398_v43 = vadd.f32 %v5788_v55, %v3359_v35  ;;  %v3362_v54 = vadd.f32 %v4452_v60, %v3078_v13  ;;  %v3076_v41 = vadd.f32 %v2951_v56, %v2673_v10 }
 0x1d1   : > { %v4421_v58 = vpop.f32.mrf.mxu1  ;;  %v2677_v3 = vadd.f32 %v5678_v59, %v2282_v8  ;;  %v2682_v13 = vadd.f32 %v5682_v20, %v2287_v16  ;;  %v2288_v56 = vadd.f32 %v5692_v33, %v5591_v30  ;;  %v2286_v20 = vadd.f32 %v5696_v4, %v5594_v44 }
 0x1d2   : > { %v4455_v22 = vpop.f32.mrf.mxu0  ;;  %v3992_v26 = vpack.c.bf16 %v3432_v42, %v3432_v42  ;;  %v3430_v24 = vmax.f32 %v3398_v43, 0.0  ;;  %v3401_v47 = vadd.f32 %v5788_v55, %v3362_v54  ;;  %v3360_v18 = vadd.f32 %v3235_v5, %v3076_v41 }
 0x1d3   : > { %v3081_v53 = vadd.f32 %v4421_v58, %v2678_v51  ;;  %v2964_v60 = vpop.f32.mrf.mxu1 }
 0x1d4   : > { %v3248_v49 = vpop.f32.mrf.mxu0  ;;  %3593 = vst.msk [vmem:[%s4648_s26 + $0x8] sm:$0xf] %vm3590_vm8, %v3992_v26  ;;  %v3990_v14 = vpack.c.bf16 %v3430_v24, %v3430_v24  ;;  %v3433_v21 = vmax.f32 %v3401_v47, 0.0  ;;  %v3399_v45 = vadd.f32 %v5788_v55, %v3360_v18  ;;  %v3079_v36 = vadd.f32 %v2964_v60, %v2676_v23 }
 0x1d5   : > { %v3365_v5 = vadd.f32 %v4455_v22, %v3081_v53  ;;  %v4422_v10 = vpop.f32.mrf.mxu1  ;;  %v2680_v26 = vadd.f32 %v5686_v0, %v2285_v52  ;;  %v2683_v24 = vadd.f32 %v5690_v39, %v2288_v56  ;;  %v2291_v47 = vadd.f32 %v5700_v12, %v5597_v28 }
 0x1d6   : > { %v4456_v29 = vpop.f32.mrf.mxu0  ;;  %3591 = vst.msk [vmem:[%s4648_s26] sm:$0xf] %vm3590_vm8, %v3990_v14  ;;  %v3993_v50 = vpack.c.bf16 %v3433_v21, %v3433_v21  ;;  %v3431_v7 = vmax.f32 %v3399_v45, 0.0  ;;  %v3363_v37 = vadd.f32 %v3248_v49, %v3079_v36  ;;  %v3082_v17 = vadd.f32 %v4422_v10, %v2679_v38 }
 0x1d7   : > { %v3404_v59 = vadd.f32 %v5788_v55, %v3365_v5  ;;  %v2967_v42 = vpop.f32.mrf.mxu1  ;;  %v2681_v60 = vadd.f32 %v5694_v27, %v2286_v20  ;;  %v2289_v14 = vadd.f32 %v5704_v61, %v5600_v48  ;;  %v2293_v20 = vadd.f32 %v5720_v6, %v5612_v57 }
 0x1d8   : > { %v3251_v35 = vpop.f32.mrf.mxu0  ;;  %3594 = vst.msk [vmem:[%s4648_s26 + $0xc] sm:$0xf] %vm3590_vm8, %v3993_v50  ;;  %v3991_v43 = vpack.c.bf16 %v3431_v7, %v3431_v7  ;;  %v3402_v54 = vadd.f32 %v5788_v55, %v3363_v37  ;;  %v3366_v41 = vadd.f32 %v4456_v29, %v3082_v17  ;;  %v3080_v22 = vadd.f32 %v2967_v42, %v2677_v3 }
 0x1d9   : > { %v3436_v23 = vmax.f32 %v3404_v59, 0.0  ;;  %v4425_v8 = vpop.f32.mrf.mxu1  ;;  %v2686_v29 = vadd.f32 %v5698_v19, %v2291_v47  ;;  %v2684_v7 = vadd.f32 %v5702_v62, %v2289_v14  ;;  %v2292_v37 = vadd.f32 %v5708_v11, %v5603_v63 }
 0x1da   : > { %v4459_v51 = vpop.f32.mrf.mxu0  ;;  %3592 = vst.msk [vmem:[%s4648_s26 + $0x4] sm:$0xf] %vm3590_vm8, %v3991_v43  ;;  %v3434_v46 = vmax.f32 %v3402_v54, 0.0  ;;  %v3405_v30 = vadd.f32 %v5788_v55, %v3366_v41  ;;  %v3364_v40 = vadd.f32 %v3251_v35, %v3080_v22  ;;  %v3085_v33 = vadd.f32 %v4425_v8, %v2682_v13 }
 0x1db   : > { %v3996_v44 = vpack.c.bf16 %v3436_v23, %v3436_v23  ;;  %v2980_v4 = vpop.f32.mrf.mxu1  ;;  %v2290_v17 = vadd.f32 %v5712_v34, %v5606_v1  ;;  %v2295_v62 = vadd.f32 %v5716_v9, %v5609_v2  ;;  %v2687_v22 = vadd.f32 %v5706_v15, %v2292_v37  ;;  %v6067_v37 = vld [vmem:[#allocation6_spill] sm:$0xff] }
 0x1dc   : > { %v3264_v58 = vpop.f32.mrf.mxu0  ;;  %v3994_v18 = vpack.c.bf16 %v3434_v46, %v3434_v46  ;;  %v3437_v49 = vmax.f32 %v3405_v30, 0.0  ;;  %v3403_v38 = vadd.f32 %v5788_v55, %v3364_v40  ;;  %v3369_v16 = vadd.f32 %v4459_v51, %v3085_v33 }
 0x1dd   : > { %3597 = vst.msk [vmem:[%s4648_s26 + $0x18] sm:$0xf] %vm3590_vm8, %v3996_v44  ;;  %v3083_v0 = vadd.f32 %v2980_v4, %v2680_v26  ;;  %v4426_v39 = vpop.f32.mrf.mxu1  ;;  %v2685_v51 = vadd.f32 %v5710_v31, %v2290_v17  ;;  %v2690_v33 = vadd.f32 %v5714_v25, %v2295_v62  ;;  %v6060_v26 = vld [vmem:[#allocation22_spill] sm:$0xff]  ;;  %v6068_v17 = vld [vmem:[#allocation28_spill] sm:$0xff] }
 0x1de   : > { %v4460_v53 = vpop.f32.mrf.mxu0  ;;  %3595 = vst.msk [vmem:[%s4648_s26 + $0x10] sm:$0xf] %vm3590_vm8, %v3994_v18  ;;  %v3997_v28 = vpack.c.bf16 %v3437_v49, %v3437_v49  ;;  %v3435_v12 = vmax.f32 %v3403_v38, 0.0  ;;  %v3408_v21 = vadd.f32 %v5788_v55, %v3369_v16  ;;  %v3086_v45 = vadd.f32 %v4426_v39, %v2683_v24  ;;  %v6061_v18 = vld [vmem:[#allocation20_spill] sm:$0xff]  ;;  %v6062_v39 = vld [vmem:[#allocation21_spill] sm:$0xff] }
 0x1df   : > { %v3367_v3 = vadd.f32 %v3264_v58, %v3083_v0  ;;  %v2983_v27 = vpop.f32.mrf.mxu1  ;;  %v6059_v58 = vld [vmem:[#allocation8_spill] sm:$0xff]  ;;  %v2688_v49 = vadd.f32 %v6061_v18, %v2293_v20 }
 0x1e0   : > { %v3267_v36 = vpop.f32.mrf.mxu0  ;;  %3598 = vst.msk [vmem:[%s4648_s26 + $0x1c] sm:$0xf] %vm3590_vm8, %v3997_v28  ;;  %v3995_v48 = vpack.c.bf16 %v3435_v12, %v3435_v12  ;;  %v3440_v61 = vmax.f32 %v3408_v21, 0.0  ;;  %v3370_v5 = vadd.f32 %v4460_v53, %v3086_v45  ;;  %v3084_v10 = vadd.f32 %v2983_v27, %v2681_v60  ;;  %v6063_v12 = vld [vmem:[#allocation9_spill] sm:$0xff]  ;;  %v6064_v21 = vld [vmem:[#allocation24_spill] sm:$0xff] }
 0x1e1   : > { %v3406_v19 = vadd.f32 %v5788_v55, %v3367_v3  ;;  %v4429_v35 = vpop.f32.mrf.mxu1  ;;  %v2296_v24 = vadd.f32 %v6060_v26, %v6059_v58  ;;  %v2294_v45 = vadd.f32 %v6064_v21, %v6063_v12  ;;  %v6080_v21 = vld [vmem:[#allocation13_spill] sm:$0xff] }
 0x1e2   : > { %v4463_v50 = vpop.f32.mrf.mxu0  ;;  %3596 = vst.msk [vmem:[%s4648_s26 + $0x14] sm:$0xf] %vm3590_vm8, %v3995_v48  ;;  %v4000_v13 = vpack.c.bf16 %v3440_v61, %v3440_v61  ;;  %v3409_v52 = vadd.f32 %v5788_v55, %v3370_v5  ;;  %v3368_v56 = vadd.f32 %v3267_v36, %v3084_v10  ;;  %v3089_v59 = vadd.f32 %v4429_v35, %v2686_v29  ;;  %v6065_v36 = vld [vmem:[#allocation10_spill] sm:$0xff] }
 0x1e3   : > { %v3438_v43 = vmax.f32 %v3406_v19, 0.0  ;;  %v2996_v54 = vpop.f32.mrf.mxu1  ;;  %v2691_v28 = vadd.f32 %v6062_v39, %v2296_v24  ;;  %v6066_v29 = vld [vmem:[#allocation26_spill] sm:$0xff]  ;;  %v2297_v19 = vadd.f32 %v6068_v17, %v6067_v37  ;;  %v6078_v39 = vld [vmem:[#allocation12_spill] sm:$0xff] }
 0x1e4   : > { %v3280_v42 = vpop.f32.mrf.mxu0  ;;  %3601 = vst.msk [vmem:[%s4648_s26 + $0x28] sm:$0xf] %vm3590_vm8, %v4000_v13  ;;  %v3441_v63 = vmax.f32 %v3409_v52, 0.0  ;;  %v3407_v1 = vadd.f32 %v5788_v55, %v3368_v56  ;;  %v3373_v11 = vadd.f32 %v4463_v50, %v3089_v59  ;;  %v3087_v34 = vadd.f32 %v2996_v54, %v2684_v7 }
 0x1e5   : > { %v3998_v2 = vpack.c.bf16 %v3438_v43, %v3438_v43  ;;  %v4430_v9 = vpop.f32.mrf.mxu1  ;;  %v2299_v3 = vadd.f32 %v6066_v29, %v6065_v36  ;;  %v6069_v43 = vld [vmem:[#allocation23_spill] sm:$0xff] }
 0x1e6   : > { %v4464_v41 = vpop.f32.mrf.mxu0  ;;  %v4001_v23 = vpack.c.bf16 %v3441_v63, %v3441_v63  ;;  %v3439_v8 = vmax.f32 %v3407_v1, 0.0  ;;  %v3412_v46 = vadd.f32 %v5788_v55, %v3373_v11  ;;  %v3371_v30 = vadd.f32 %v3280_v42, %v3087_v34  ;;  %v6070_v63 = vld [vmem:[#allocation25_spill] sm:$0xff]  ;;  %v6071_v11 = vld [vmem:[#allocation7_spill] sm:$0xff]  ;;  %v6072_v34 = vld [vmem:[#allocation30_spill] sm:$0xff] }
 0x1e7   : > { %3599 = vst.msk [vmem:[%s4648_s26 + $0x20] sm:$0xf] %vm3590_vm8, %v3998_v2  ;;  %v3090_v15 = vadd.f32 %v4430_v9, %v2687_v22  ;;  %v2999_v31 = vpop.f32.mrf.mxu1  ;;  %v2689_v54 = vadd.f32 %v6069_v43, %v2294_v45  ;;  %v2694_v1 = vadd.f32 %v6070_v63, %v2299_v3  ;;  %v6081_v45 = vld [vmem:[#allocation36_spill] sm:$0xff]  ;;  %v6085_v43 = vld [vmem:[#allocation35_spill] sm:$0xff] }
 0x1e8   : > { %v3283_v40 = vpop.f32.mrf.mxu0  ;;  %3602 = vst.msk [vmem:[%s4648_s26 + $0x2c] sm:$0xf] %vm3590_vm8, %v4001_v23  ;;  %v3999_v57 = vpack.c.bf16 %v3439_v8, %v3439_v8  ;;  %v3444_v6 = vmax.f32 %v3412_v46, 0.0  ;;  %v3410_v47 = vadd.f32 %v5788_v55, %v3371_v30  ;;  %v3088_v44 = vadd.f32 %v2999_v31, %v2685_v51  ;;  %v6073_v46 = vld [vmem:[#allocation27_spill] sm:$0xff] }
 0x1e9   : > { %v3374_v38 = vadd.f32 %v4464_v41, %v3090_v15  ;;  %v4433_v25 = vpop.f32.mrf.mxu1  ;;  %v2300_v41 = vadd.f32 %v6072_v34, %v6071_v11  ;;  %v2692_v30 = vadd.f32 %v6073_v46, %v2297_v19  ;;  %v2301_v36 = vadd.f32 %v6081_v45, %v6080_v21  ;;  %v6086_v63 = vld [vmem:[#allocation15_spill] sm:$0xff]  ;;  %v6089_v46 = vld [vmem:[#allocation16_spill] sm:$0xff] }
 0x1ea   : > { %v4467_v4 = vpop.f32.mrf.mxu0  ;;  %3600 = vst.msk [vmem:[%s4648_s26 + $0x24] sm:$0xf] %vm3590_vm8, %v3999_v57  ;;  %v4004_v16 = vpack.c.bf16 %v3444_v6, %v3444_v6  ;;  %v3442_v53 = vmax.f32 %v3410_v47, 0.0  ;;  %v3372_v60 = vadd.f32 %v3283_v40, %v3088_v44  ;;  %v3093_v14 = vadd.f32 %v4433_v25, %v2690_v33  ;;  %v6074_v40 = vld [vmem:[#allocation11_spill] sm:$0xff]  ;;  %v6075_v33 = vld [vmem:[#allocation32_spill] sm:$0xff]  ;;  %v6076_v44 = vld [vmem:[#allocation29_spill] sm:$0xff] }
 0x1eb   : > { %v3413_v27 = vadd.f32 %v5788_v55, %v3374_v38  ;;  %v3012_v48 = vpop.f32.mrf.mxu1  ;;  %v2298_v58 = vadd.f32 %v6075_v33, %v6074_v40 }
 0x1ec   : > { %v3296_v0 = vpop.f32.mrf.mxu0  ;;  %3605 = vst.msk [vmem:[%s4648_s26 + $0x38] sm:$0xf] %vm3590_vm8, %v4004_v16  ;;  %v4002_v61 = vpack.c.bf16 %v3442_v53, %v3442_v53  ;;  %v3411_v5 = vadd.f32 %v5788_v55, %v3372_v60  ;;  %v3377_v10 = vadd.f32 %v4467_v4, %v3093_v14  ;;  %v3091_v50 = vadd.f32 %v3012_v48, %v2688_v49  ;;  %v6077_v14 = vld [vmem:[#allocation31_spill] sm:$0xff] }
 0x1ed   : > { %v3445_v35 = vmax.f32 %v3413_v27, 0.0  ;;  %v4434_v13 = vpop.f32.mrf.mxu1  ;;  %v2695_v4 = vadd.f32 %v6076_v44, %v2300_v41 }
 0x1ee   : > { %v4468_v7 = vpop.f32.mrf.mxu0  ;;  %3603 = vst.msk [vmem:[%s4648_s26 + $0x30] sm:$0xf] %vm3590_vm8, %v4002_v61  ;;  %v3443_v52 = vmax.f32 %v3411_v5, 0.0  ;;  %v3416_v56 = vadd.f32 %v5788_v55, %v3377_v10  ;;  %v3375_v59 = vadd.f32 %v3296_v0, %v3091_v50  ;;  %v3094_v42 = vadd.f32 %v4434_v13, %v2691_v28  ;;  %v6079_v28 = vld [vmem:[#allocation34_spill] sm:$0xff] }
 0x1ef   : > { %v4005_v22 = vpack.c.bf16 %v3445_v35, %v3445_v35  ;;  %v3015_v51 = vpop.f32.mrf.mxu1  ;;  %v2693_v0 = vadd.f32 %v6077_v14, %v2298_v58  ;;  %v2303_v12 = vadd.f32 %v6079_v28, %v6078_v39  ;;  %v6082_v50 = vld [vmem:[#allocation14_spill] sm:$0xff]  ;;  %v6093_v14 = vld [vmem:[#allocation17_spill] sm:$0xff] }
 0x1f0   : > { %v3299_v62 = vpop.f32.mrf.mxu0  ;;  %v4003_v20 = vpack.c.bf16 %v3443_v52, %v3443_v52  ;;  %v3448_v2 = vmax.f32 %v3416_v56, 0.0  ;;  %v3414_v9 = vadd.f32 %v5788_v55, %v3375_v59  ;;  %v3378_v23 = vadd.f32 %v4468_v7, %v3094_v42  ;;  %v6083_v7 = vld [vmem:[#allocation38_spill] sm:$0xff]  ;;  %v6084_v42 = vld [vmem:[#allocation33_spill] sm:$0xff] }
 0x1f1   : > { %3606 = vst.msk [vmem:[%s4648_s26 + $0x3c] sm:$0xf] %vm3590_vm8, %v4005_v22  ;;  %v3092_v26 = vadd.f32 %v3015_v51, %v2689_v54  ;;  %v4437_v24 = vpop.f32.mrf.mxu1  ;;  %v2304_v37 = vadd.f32 %v6083_v7, %v6082_v50  ;;  %v2696_v54 = vadd.f32 %v6085_v43, %v2301_v36  ;;  %v6095_v28 = vld [vmem:[#allocation18_spill] sm:$0xff] }
 0x1f2   : > { %v4471_v8 = vpop.f32.mrf.mxu0  ;;  %3604 = vst.msk [vmem:[%s4648_s26 + $0x34] sm:$0xf] %vm3590_vm8, %v4003_v20  ;;  %v4008_v15 = vpack.c.bf16 %v3448_v2, %v3448_v2  ;;  %v3446_v31 = vmax.f32 %v3414_v9, 0.0  ;;  %v3417_v57 = vadd.f32 %v5788_v55, %v3378_v23  ;;  %v3097_v6 = vadd.f32 %v4437_v24, %v2694_v1  ;;  %v6087_v1 = vld [vmem:[#allocation40_spill] sm:$0xff]  ;;  %v6088_v23 = vld [vmem:[#allocation37_spill] sm:$0xff] }
 0x1f3   : > { %v3376_v18 = vadd.f32 %v3299_v62, %v3092_v26  ;;  %v3028_v49 = vpop.f32.mrf.mxu1  ;;  %v2698_v62 = vadd.f32 %v6084_v42, %v2303_v12  ;;  %v2302_v11 = vadd.f32 %v6087_v1, %v6086_v63  ;;  %v2308_v12 = vadd.f32 %v5773_v32, %v6095_v28 }
 0x1f4   : > { %v3312_v47 = vpop.f32.mrf.mxu0  ;;  %3609 = vst.msk [vmem:[%s4648_s26 + $0x48] sm:$0xf] %vm3590_vm8, %v4008_v15  ;;  %v4006_v38 = vpack.c.bf16 %v3446_v31, %v3446_v31  ;;  %v3449_v25 = vmax.f32 %v3417_v57, 0.0  ;;  %v3381_v16 = vadd.f32 %v4471_v8, %v3097_v6  ;;  %v3095_v53 = vadd.f32 %v3028_v49, %v2692_v30  ;;  %v6090_v30 = vld [vmem:[#allocation42_spill] sm:$0xff]  ;;  %v6091_v6 = vld [vmem:[#allocation39_spill] sm:$0xff] }
 0x1f5   : > { %v3415_v29 = vadd.f32 %v5788_v55, %v3376_v18  ;;  %v4438_v3 = vpop.f32.mrf.mxu1  ;;  %v2699_v8 = vadd.f32 %v6088_v23, %v2304_v37  ;;  %v2307_v40 = vadd.f32 %v6090_v30, %v6089_v46 }
 0x1f6   : > { %v4472_v60 = vpop.f32.mrf.mxu0  ;;  %3607 = vst.msk [vmem:[%s4648_s26 + $0x40] sm:$0xf] %vm3590_vm8, %v4006_v38  ;;  %v4009_v27 = vpack.c.bf16 %v3449_v25, %v3449_v25  ;;  %v3420_v48 = vadd.f32 %v5788_v55, %v3381_v16  ;;  %v3379_v61 = vadd.f32 %v3312_v47, %v3095_v53  ;;  %v3098_v5 = vadd.f32 %v4438_v3, %v2695_v4  ;;  %v6092_v53 = vld [vmem:[#allocation41_spill] sm:$0xff] }
 0x1f7   : > { %v3447_v17 = vmax.f32 %v3415_v29, 0.0  ;;  %v3031_v19 = vpop.f32.mrf.mxu1  ;;  %v2697_v47 = vadd.f32 %v6091_v6, %v2302_v11 }
 0x1f8   : > { %v3315_v10 = vpop.f32.mrf.mxu0  ;;  %3610 = vst.msk [vmem:[%s4648_s26 + $0x4c] sm:$0xf] %vm3590_vm8, %v4009_v27  ;;  %v3452_v35 = vmax.f32 %v3420_v48, 0.0  ;;  %v3418_v13 = vadd.f32 %v5788_v55, %v3379_v61  ;;  %v3382_v52 = vadd.f32 %v4472_v60, %v3098_v5  ;;  %v3096_v56 = vadd.f32 %v3031_v19, %v2693_v0  ;;  %v6094_v0 = vld [vmem:[#allocation44_spill] sm:$0xff]  ;;  %v6096_v61 = vld [vmem:[#allocation19_spill] sm:$0xff] }
 0x1f9   : > { %v4007_v34 = vpack.c.bf16 %v3447_v17, %v3447_v17  ;;  %v4441_v41 = vpop.f32.mrf.mxu1  ;;  %v2702_v60 = vadd.f32 %v6092_v53, %v2307_v40  ;;  %v2305_v39 = vadd.f32 %v6094_v0, %v6093_v14  ;;  %v6097_v5 = vld [vmem:[#allocation47_spill] sm:$0xff] }
 0x1fa   : > { %v4475_v59 = vpop.f32.mrf.mxu0  ;;  %v4012_v22 = vpack.c.bf16 %v3452_v35, %v3452_v35  ;;  %v3450_v51 = vmax.f32 %v3418_v13, 0.0  ;;  %v3421_v20 = vadd.f32 %v5788_v55, %v3382_v52  ;;  %v3380_v2 = vadd.f32 %v3315_v10, %v3096_v56  ;;  %v6098_v13 = vld [vmem:[#allocation43_spill] sm:$0xff]  ;;  %v6099_v56 = vld [vmem:[#allocation45_spill] sm:$0xff] }
 0x1fb   : > { %3608 = vst.msk [vmem:[%s4648_s26 + $0x44] sm:$0xf] %vm3590_vm8, %v4007_v34  ;;  %v3101_v33 = vadd.f32 %v4441_v41, %v2698_v62  ;;  %v3044_v58 = vpop.f32.mrf.mxu1  ;;  %v2306_v10 = vadd.f32 %v6097_v5, %v6096_v61  ;;  %v2700_v52 = vadd.f32 %v6098_v13, %v2305_v39  ;;  %v6100_v34 = vld [vmem:[#allocation46_spill] sm:$0xff] }
 0x1fc   : > { %v3328_v9 = vpop.f32.mrf.mxu0  ;;  %3613 = vst.msk [vmem:[%s4648_s26 + $0x58] sm:$0xf] %vm3590_vm8, %v4012_v22  ;;  %v4010_v26 = vpack.c.bf16 %v3450_v51, %v3450_v51  ;;  %v3453_v24 = vmax.f32 %v3421_v20, 0.0  ;;  %v3419_v15 = vadd.f32 %v5788_v55, %v3380_v2  ;;  %v3099_v31 = vadd.f32 %v3044_v58, %v2696_v54 }
 0x1fd   : > { %v3385_v44 = vadd.f32 %v4475_v59, %v3101_v33  ;;  %v4442_v4 = vpop.f32.mrf.mxu1  ;;  %v2703_v59 = vadd.f32 %v6099_v56, %v2308_v12  ;;  %v2701_v41 = vadd.f32 %v6100_v34, %v2306_v10 }
 0x1fe   : > { %v4476_v57 = vpop.f32.mrf.mxu0  ;;  %3611 = vst.msk [vmem:[%s4648_s26 + $0x50] sm:$0xf] %vm3590_vm8, %v4010_v26  ;;  %v4013_v18 = vpack.c.bf16 %v3453_v24, %v3453_v24  ;;  %v3451_v49 = vmax.f32 %v3419_v15, 0.0  ;;  %v3383_v38 = vadd.f32 %v3328_v9, %v3099_v31  ;;  %v3102_v25 = vadd.f32 %v4442_v4, %v2699_v8 }
 0x1ff   : > { %v3424_v21 = vadd.f32 %v5788_v55, %v3385_v44  ;;  %v3047_v45 = vpop.f32.mrf.mxu1 }
 0x200   : > { %v3331_v16 = vpop.f32.mrf.mxu0  ;;  %3614 = vst.msk [vmem:[%s4648_s26 + $0x5c] sm:$0xf] %vm3590_vm8, %v4013_v18  ;;  %v4011_v36 = vpack.c.bf16 %v3451_v49, %v3451_v49  ;;  %v3422_v29 = vadd.f32 %v5788_v55, %v3383_v38  ;;  %v3386_v3 = vadd.f32 %v4476_v57, %v3102_v25  ;;  %v3100_v27 = vadd.f32 %v3047_v45, %v2697_v47 }
 0x201   : > { %v3456_v50 = vmax.f32 %v3424_v21, 0.0  ;;  %v4445_v7 = vpop.f32.mrf.mxu1 }
 0x202   : > { %v4479_v48 = vpop.f32.mrf.mxu0  ;;  %3612 = vst.msk [vmem:[%s4648_s26 + $0x54] sm:$0xf] %vm3590_vm8, %v4011_v36  ;;  %v3454_v32 = vmax.f32 %v3422_v29, 0.0  ;;  %v3425_v37 = vadd.f32 %v5788_v55, %v3386_v3  ;;  %v3384_v17 = vadd.f32 %v3331_v16, %v3100_v27  ;;  %v3105_v19 = vadd.f32 %v4445_v7, %v2702_v60 }
 0x203   : > { %v4016_v42 = vpack.c.bf16 %v3456_v50, %v3456_v50  ;;  %v3060_v62 = vpop.f32.mrf.mxu1 }
 0x204   : > { %v3344_v35 = vpop.f32.mrf.mxu0  ;;  %v4014_v43 = vpack.c.bf16 %v3454_v32, %v3454_v32  ;;  %v3457_v54 = vmax.f32 %v3425_v37, 0.0  ;;  %v3423_v63 = vadd.f32 %v5788_v55, %v3384_v17  ;;  %v3389_v1 = vadd.f32 %v4479_v48, %v3105_v19 }
 0x205   : > { %3617 = vst.msk [vmem:[%s4648_s26 + $0x68] sm:$0xf] %vm3590_vm8, %v4016_v42  ;;  %v3103_v22 = vadd.f32 %v3060_v62, %v2700_v52  ;;  %v4446_v51 = vpop.f32.mrf.mxu1 }
 0x206   : > { %v4480_v11 = vpop.f32.mrf.mxu0  ;;  %3615 = vst.msk [vmem:[%s4648_s26 + $0x60] sm:$0xf] %vm3590_vm8, %v4014_v43  ;;  %v4017_v20 = vpack.c.bf16 %v3457_v54, %v3457_v54  ;;  %v3455_v2 = vmax.f32 %v3423_v63, 0.0  ;;  %v3428_v9 = vadd.f32 %v5788_v55, %v3389_v1  ;;  %v3106_v23 = vadd.f32 %v4446_v51, %v2703_v59 }
 0x207   : > { %v3387_v8 = vadd.f32 %v3344_v35, %v3103_v22  ;;  %v3063_v46 = vpop.f32.mrf.mxu1 }
 0x208   : > { %v3347_v30 = vpop.f32.mrf.mxu0  ;;  %3618 = vst.msk [vmem:[%s4648_s26 + $0x6c] sm:$0xf] %vm3590_vm8, %v4017_v20  ;;  %v4015_v40 = vpack.c.bf16 %v3455_v2, %v3455_v2  ;;  %v3460_v33 = vmax.f32 %v3428_v9, 0.0  ;;  %v3390_v58 = vadd.f32 %v4480_v11, %v3106_v23  ;;  %v3104_v26 = vadd.f32 %v3063_v46, %v2701_v41 }
 0x209   : > { %v3426_v24 = vadd.f32 %v5788_v55, %v3387_v8 }
 0x20a   : > { %3616 = vst.msk [vmem:[%s4648_s26 + $0x64] sm:$0xf] %vm3590_vm8, %v4015_v40  ;;  %v4020_v15 = vpack.c.bf16 %v3460_v33, %v3460_v33  ;;  %v3429_v31 = vadd.f32 %v5788_v55, %v3390_v58  ;;  %v3388_v57 = vadd.f32 %v3347_v30, %v3104_v26 }
 0x20b   : > { %v3458_v6 = vmax.f32 %v3426_v24, 0.0 }
 0x20c   : > { %3621 = vst.msk [vmem:[%s4648_s26 + $0x78] sm:$0xf] %vm3590_vm8, %v4020_v15  ;;  %v3461_v47 = vmax.f32 %v3429_v31, 0.0  ;;  %v3427_v44 = vadd.f32 %v5788_v55, %v3388_v57 }
 0x20d   : > { %v4018_v4 = vpack.c.bf16 %v3458_v6, %v3458_v6 }
 0x20e   : > { %v4021_v18 = vpack.c.bf16 %v3461_v47, %v3461_v47  ;;  %v3459_v49 = vmax.f32 %v3427_v44, 0.0 }
 0x20f   : > { %3619 = vst.msk [vmem:[%s4648_s26 + $0x70] sm:$0xf] %vm3590_vm8, %v4018_v4 }
 0x210   : > { %3622 = vst.msk [vmem:[%s4648_s26 + $0x7c] sm:$0xf] %vm3590_vm8, %v4021_v18  ;;  %v4019_v38 = vpack.c.bf16 %v3459_v49, %v3459_v49 }
 0x212   : > { %3620 = vst.msk [vmem:[%s4648_s26 + $0x74] sm:$0xf] %vm3590_vm8, %v4019_v38 }
 0x213 PF: > { %s13_s14 = sadd.s32 1, %s4597_s14   ;;  %s6101_s12 = smov %s4593_s13 }
 0x214   : > { %p10_p5 = scmp.ge.s32.totalorder %s13_s14, 5   ;;  %s6102_s13 = smov %s6104_s15 }
 0x216   :  { %12 = sbr.rel (!%p10_p5) target bundleno = 2 (0x2), region = 125 }
 0x21b   :  { %3651 = vsyncmov [#allocation3] }
 0x21e   :  { %s3652_s23 = vpop.sfrf %3651 }
 0x21f   :  { %p3989_p6 = scmp.ne.s32.totalorder %s3652_s23, 0 }
 0x221   :  { %3656 = shalt.err (%p3989_p6)  }

</bundles_post_ra>
